<compile_context>
chip_gen: v5e
topology: v5e:2x2
jax: 0.10.0
libtpu: 0.0.40
codegen_flags: <defaults>
</compile_context>

<pallas_src>
import functools

import numpy as np
import jax
import jax.numpy as jnp
from jax import lax
from jax.experimental import pallas as pl
from jax.experimental.pallas import tpu as pltpu


# ----------------------------------------------------------------------------
# Pallas kernel
# ----------------------------------------------------------------------------
def _nas_weighted_ops_kernel(
    wmx_ref,     # SMEM (1,)        softmax weight of maxpool3x3
    xd_ref,      # VMEM (C, H, 9L)  aligned 9-tap window slabs, channel-rotated
    coefA_ref,   # VMEM (C*9, L)    alpha-folded conv3x3+conv1x1+dconv+avg+skip
    coefS_ref,   # VMEM (C*9, L)    sepconv depthwise*pointwise (pre-BN)
    gamma_ref,   # VMEM (1, L)      w_sep * bn_gamma, per lane
    beta_ref,    # VMEM (1, L)      w_sep * bn_beta, per lane
    pdn_ref,     # VMEM (L, CP)     lane -> channel mean projection (x 1/(NHW))
    pup_ref,     # VMEM (CP, L)     channel -> lane broadcast-back
    out_ref,     # VMEM (H, L)
    *, cn,       # static: C*N (lane stride of one spatial column)
):
    H, L = out_ref.shape
    C = xd_ref.shape[0]
    NTAP = 9

    coefA = coefA_ref[...]                                   # (C*9, L)
    coefS = coefS_ref[...]                                   # (C*9, L)

    row = lax.broadcasted_iota(jnp.int32, (H, L), 0)
    lane = lax.broadcasted_iota(jnp.int32, (H, L), 1)

    accA = jnp.zeros((H, L), jnp.float32)   # conv3+conv1+depthconv+avg+skip
    accS = jnp.zeros((H, L), jnp.float32)   # sepconv pre-BN
    maxw = None
    xc = None

    for d in range(C):                      # channel-rotation offset (delta)
        xslab = xd_ref[d]                   # (H, 9L), one aligned VMEM load
        if d == 0:
            xc = xslab[:, 4 * L:5 * L]      # center tap, delta=0 == input
            maxw = xc
        for t in range(NTAP):
            win = xslab[:, t * L:(t + 1) * L]   # 128-lane-aligned vreg slice
            k = d * NTAP + t
            accA = accA + win * coefA[k:k + 1, :]
            accS = accS + win * coefS[k:k + 1, :]

            # maxpool3x3 uses only the un-rotated (delta==0) windows.  Zero
            # padding is masked by substituting the always-valid (stride=1,
            # pad=1) center element so negative inputs behave like MaxPool2d.
            if d == 0 and t != 4:
                dh, dw = t // 3, t % 3
                valid = None
                if dh == 0:
                    valid = row >= 1
                if dh == 2:
                    valid = row <= H - 2
                if dw == 0:
                    cnd = lane >= cn
                    valid = cnd if valid is None else (valid & cnd)
                if dw == 2:
                    cnd = lane < L - cn
                    valid = cnd if valid is None else (valid & cnd)
                maxw = jnp.maximum(maxw, jnp.where(valid, win, xc))

    # BatchNorm (training-mode, biased batch statistics) on the sepconv path.
    # Rank-C projection: stacked (2,L) stats -> per-channel -> broadcast back.
    s1 = jnp.sum(accS, axis=0, keepdims=True)                # (1, L)
    s2 = jnp.sum(accS * accS, axis=0, keepdims=True)         # (1, L)
    stats = jnp.concatenate([s1, s2], axis=0)                # (2, L)
    per_c = jnp.dot(stats, pdn_ref[...],
                    preferred_element_type=jnp.float32,
                    precision=lax.Precision.HIGHEST)          # (2, CP)
    back = jnp.dot(per_c, pup_ref[...],
                   preferred_element_type=jnp.float32,
                   precision=lax.Precision.HIGHEST)           # (2, L)
    mean = back[0:1, :]
    var = back[1:2, :] - mean * mean
    inv = lax.rsqrt(var + 1e-5)
    bn = (accS - mean) * (inv * gamma_ref[...]) + beta_ref[...]

    # 3-term epilogue, lane-dense unmasked store.
    out_ref[...] = accA + wmx_ref[0] * maxw + bn


# ----------------------------------------------------------------------------
# Wrapper: layout plumbing + alpha folding (softmax computed on host/XLA side)
# ----------------------------------------------------------------------------
@jax.jit
def searchable_operation_forward(x_nchw, params):
    x = x_nchw.astype(jnp.float32)
    N, C, H, W = x.shape
    CN = C * N
    L = W * CN                    # kernel lane width (= 128 at the test shape)
    NTAP = 9
    CP = max(C, 8)                # padded channel count for the tiny BN matmuls

    # softmax over the 8 architecture logits (wrapper side, per review)
    wts = jax.nn.softmax(params["alpha"].reshape(-1).astype(jnp.float32))
    w_c3, w_c1, w_mx, w_av, w_sk, w_sep, w_dd = (wts[i] for i in range(7))
    # op order: conv3x3, conv1x1, maxpool3x3, avgpool3x3, skip, sepconv3x3,
    #           depthconv3x3, zero ('zero' contributes nothing).

    # ---- activations: lane-aligned 9-tap window slabs, one per channel
    # rotation delta.  lane = w*CN + c*N + n; slab[delta] tap (dh,dw) at lane
    # (w,c,n) holds x_pad[h+dh, w+dw, (c+delta)%C, n].
    xt = jnp.transpose(x, (2, 3, 1, 0))                      # (H, W, C, N)
    xp = jnp.pad(xt, ((1, 1), (1, 1), (0, 0), (0, 0)))       # zero pad H, W
    slabs = []
    for delta in range(C):
        xr = jnp.roll(xp, shift=-delta, axis=2)              # channel rotate
        xr = xr.reshape(H + 2, (W + 2) * CN)
        taps = [xr[dh:dh + H, dw * CN:dw * CN + L]
                for dh in range(3) for dw in range(3)]
        slabs.append(jnp.concatenate(taps, axis=1))          # (H, 9L)
    xd = jnp.stack(slabs, axis=0)                            # (C, H, 9L)

    # ---- per-lane coefficient tables (softmax weights folded in) -----------
    chan = (jnp.arange(L) // N) % C                          # output channel
    w3 = params["w_conv3"].astype(jnp.float32)               # (3,3,Cin,Cout)
    w1 = params["w_conv1"].astype(jnp.float32)               # (Cin,Cout)
    wdsep = params["w_dwsep"].astype(jnp.float32)            # (3,3,C)
    wpsep = params["w_pwsep"].astype(jnp.float32)            # (Cin,Cout)
    wddep = params["w_dwdep"].astype(jnp.float32)            # (3,3,C)

    rowsA, rowsS = [], []
    for delta in range(C):
        ci = (chan + delta) % C                              # input channel
        for t in range(NTAP):
            kh, kw = t // 3, t % 3
            a = w_c3 * w3[kh, kw, ci, chan]                  # conv3x3
            if t == 4:
                a = a + w_c1 * w1[ci, chan]                  # conv1x1 (center)
            if delta == 0:                                   # ci == chan terms
                a = a + w_dd * wddep[kh, kw, chan] + w_av * (1.0 / 9.0)
                if t == 4:
                    a = a + w_sk                             # skip (identity)
            rowsA.append(a)
            rowsS.append(wdsep[kh, kw, ci] * wpsep[ci, chan])
    coefA = jnp.stack(rowsA, axis=0)                         # (C*9, L)
    coefS = jnp.stack(rowsS, axis=0)                         # (C*9, L)

    gammaL = (w_sep * params["bn_gamma"].astype(jnp.float32))[chan][None, :]
    betaL = (w_sep * params["bn_beta"].astype(jnp.float32))[chan][None, :]

    onehot = (chan[:, None] == jnp.arange(CP)[None, :]).astype(jnp.float32)
    pdn = onehot / float(N * H * W)                          # (L, CP)
    pup = onehot.T                                           # (CP, L)

    wmx = w_mx.reshape(1)                                    # SMEM scalar

    vmem = pl.BlockSpec(memory_space=pltpu.MemorySpace.VMEM)
    smem = pl.BlockSpec(memory_space=pltpu.MemorySpace.SMEM)
    out2d = pl.pallas_call(
        functools.partial(_nas_weighted_ops_kernel, cn=CN),
        out_shape=jax.ShapeDtypeStruct((H, L), jnp.float32),
        in_specs=[smem, vmem, vmem, vmem, vmem, vmem, vmem, vmem],
        out_specs=vmem,
    )(wmx, xd, coefA, coefS, gammaL, betaL, pdn, pup)

    out = out2d.reshape(H, W, C, N)
    return jnp.transpose(out, (3, 2, 0, 1))                  # -> NCHW


# ----------------------------------------------------------------------------
# Pure-JAX reference (verification only)
# ----------------------------------------------------------------------------
def reference_forward(x_nchw, p):
    hi = lax.Precision.HIGHEST
    x = jnp.transpose(x_nchw, (0, 2, 3, 1)).astype(jnp.float32)
    N, H, W, C = x.shape
    wts = jax.nn.softmax(p["alpha"])
    dn = ("NHWC", "HWIO", "NHWC")
    pad = ((1, 1), (1, 1))

    conv3 = lax.conv_general_dilated(x, p["w_conv3"], (1, 1), pad,
                                     dimension_numbers=dn, precision=hi)
    conv1 = jnp.einsum("nhwi,io->nhwo", x, p["w_conv1"], precision=hi)
    maxp = lax.reduce_window(x, -jnp.inf, lax.max, (1, 3, 3, 1), (1, 1, 1, 1),
                             ((0, 0), (1, 1), (1, 1), (0, 0)))
    avgp = lax.reduce_window(x, 0.0, lax.add, (1, 3, 3, 1), (1, 1, 1, 1),
                             ((0, 0), (1, 1), (1, 1), (0, 0))) / 9.0
    skip = x
    dwsep = lax.conv_general_dilated(x, p["w_dwsep"].reshape(3, 3, 1, C),
                                     (1, 1), pad, dimension_numbers=dn,
                                     feature_group_count=C, precision=hi)
    pw = jnp.einsum("nhwi,io->nhwo", dwsep, p["w_pwsep"], precision=hi)
    mean = jnp.mean(pw, axis=(0, 1, 2), keepdims=True)
    var = jnp.mean((pw - mean) ** 2, axis=(0, 1, 2), keepdims=True)
    sep = (pw - mean) / jnp.sqrt(var + 1e-5) * p["bn_gamma"] + p["bn_beta"]
    dwdep = lax.conv_general_dilated(x, p["w_dwdep"].reshape(3, 3, 1, C),
                                     (1, 1), pad, dimension_numbers=dn,
                                     feature_group_count=C, precision=hi)

    out = (wts[0] * conv3 + wts[1] * conv1 + wts[2] * maxp + wts[3] * avgp
           + wts[4] * skip + wts[5] * sep + wts[6] * dwdep + wts[7] * 0.0)
    return jnp.transpose(out, (0, 3, 1, 2))


if __name__ == "__main__":
    key = jax.random.PRNGKey(0)
    ks = jax.random.split(key, 8)

    N, C, H, W = 2, 4, 16, 16            # stride=1, C_in == C_out == 4
    x = jax.random.normal(ks[0], (N, C, H, W), jnp.float32)

    params = {
        "alpha":    jax.random.normal(ks[1], (8,), jnp.float32),
        "w_conv3":  0.1 * jax.random.normal(ks[2], (3, 3, C, C), jnp.float32),
        "w_conv1":  0.1 * jax.random.normal(ks[3], (C, C), jnp.float32),
        "w_dwsep":  0.1 * jax.random.normal(ks[4], (3, 3, C), jnp.float32),
        "w_pwsep":  0.1 * jax.random.normal(ks[5], (C, C), jnp.float32),
        "w_dwdep":  0.1 * jax.random.normal(ks[6], (3, 3, C), jnp.float32),
        "bn_gamma": jnp.ones((C,), jnp.float32),    # BatchNorm2d default init
        "bn_beta":  jnp.zeros((C,), jnp.float32),
    }

    out = searchable_operation_forward(x, params)
    out = jax.block_until_ready(out)

    ref = reference_forward(x, params)
    np.testing.assert_allclose(np.asarray(out), np.asarray(ref),
                               atol=1e-3, rtol=1e-3)
    print("KERNEL_OK")
</pallas_src>

<mosaic_0001>
module attributes {stable_mosaic.version = 11 : i64} {
  func.func @_nas_weighted_ops_kernel(%arg0: memref<1xf32, #tpu.memory_space<smem>>, %arg1: memref<4x16x1152xf32, #tpu.memory_space<vmem>>, %arg2: memref<36x128xf32, #tpu.memory_space<vmem>>, %arg3: memref<36x128xf32, #tpu.memory_space<vmem>>, %arg4: memref<1x128xf32, #tpu.memory_space<vmem>>, %arg5: memref<1x128xf32, #tpu.memory_space<vmem>>, %arg6: memref<128x8xf32, #tpu.memory_space<vmem>>, %arg7: memref<8x128xf32, #tpu.memory_space<vmem>>, %arg8: memref<16x128xf32, #tpu.memory_space<vmem>>) attributes {dimension_semantics = [], scalar_prefetch = 0 : i64, scratch_operands = 0 : i64, tpu.core_type = #tpu.core_type<tc>} {
    %c0 = arith.constant 0 : index
    %c0_0 = arith.constant 0 : index
    %0 = vector.load %arg2[%c0, %c0_0] : memref<36x128xf32, #tpu.memory_space<vmem>>, vector<36x128xf32>
    %c0_1 = arith.constant 0 : index
    %c0_2 = arith.constant 0 : index
    %1 = vector.load %arg3[%c0_1, %c0_2] : memref<36x128xf32, #tpu.memory_space<vmem>>, vector<36x128xf32>
    %2 = tpu.iota {dimensions = array<i32: 0>} : vector<16x128xi32>
    %3 = tpu.iota {dimensions = array<i32: 1>} : vector<16x128xi32>
    %cst = arith.constant 0.000000e+00 : f32
    %4 = vector.broadcast %cst : f32 to vector<16x128xf32>
    %cst_3 = arith.constant 0.000000e+00 : f32
    %5 = vector.broadcast %cst_3 : f32 to vector<16x128xf32>
    %c0_4 = arith.constant 0 : index
    %c0_5 = arith.constant 0 : index
    %c0_6 = arith.constant 0 : index
    %6 = vector.load %arg1[%c0_4, %c0_5, %c0_6] : memref<4x16x1152xf32, #tpu.memory_space<vmem>>, vector<1x16x1152xf32>
    %7 = vector.shape_cast %6 : vector<1x16x1152xf32> to vector<16x1152xf32>
    %8 = vector.extract_strided_slice %7 {offsets = [0, 512], sizes = [16, 128], strides = [1, 1]} : vector<16x1152xf32> to vector<16x128xf32>
    %9 = vector.extract_strided_slice %7 {offsets = [0, 0], sizes = [16, 128], strides = [1, 1]} : vector<16x1152xf32> to vector<16x128xf32>
    %10 = vector.extract_strided_slice %0 {offsets = [0, 0], sizes = [1, 128], strides = [1, 1]} : vector<36x128xf32> to vector<1x128xf32>
    %11 = vector.broadcast %10 : vector<1x128xf32> to vector<16x128xf32>
    %12 = arith.mulf %9, %11 : vector<16x128xf32>
    %13 = arith.addf %4, %12 : vector<16x128xf32>
    %14 = vector.extract_strided_slice %1 {offsets = [0, 0], sizes = [1, 128], strides = [1, 1]} : vector<36x128xf32> to vector<1x128xf32>
    %15 = vector.broadcast %14 : vector<1x128xf32> to vector<16x128xf32>
    %16 = arith.mulf %9, %15 : vector<16x128xf32>
    %17 = arith.addf %5, %16 : vector<16x128xf32>
    %c1_i32 = arith.constant 1 : i32
    %18 = vector.broadcast %c1_i32 : i32 to vector<16x128xi32>
    %19 = arith.cmpi sge, %2, %18 : vector<16x128xi32>
    %c8_i32 = arith.constant 8 : i32
    %20 = vector.broadcast %c8_i32 : i32 to vector<16x128xi32>
    %21 = arith.cmpi sge, %3, %20 : vector<16x128xi32>
    %22 = arith.andi %19, %21 : vector<16x128xi1>
    %23 = arith.select %22, %9, %8 : vector<16x128xi1>, vector<16x128xf32>
    %24 = arith.maximumf %8, %23 : vector<16x128xf32>
    %25 = vector.extract_strided_slice %7 {offsets = [0, 128], sizes = [16, 128], strides = [1, 1]} : vector<16x1152xf32> to vector<16x128xf32>
    %26 = vector.extract_strided_slice %0 {offsets = [1, 0], sizes = [1, 128], strides = [1, 1]} : vector<36x128xf32> to vector<1x128xf32>
    %27 = vector.broadcast %26 : vector<1x128xf32> to vector<16x128xf32>
    %28 = arith.mulf %25, %27 : vector<16x128xf32>
    %29 = arith.addf %13, %28 : vector<16x128xf32>
    %30 = vector.extract_strided_slice %1 {offsets = [1, 0], sizes = [1, 128], strides = [1, 1]} : vector<36x128xf32> to vector<1x128xf32>
    %31 = vector.broadcast %30 : vector<1x128xf32> to vector<16x128xf32>
    %32 = arith.mulf %25, %31 : vector<16x128xf32>
    %33 = arith.addf %17, %32 : vector<16x128xf32>
    %c1_i32_7 = arith.constant 1 : i32
    %34 = vector.broadcast %c1_i32_7 : i32 to vector<16x128xi32>
    %35 = arith.cmpi sge, %2, %34 : vector<16x128xi32>
    %36 = arith.select %35, %25, %8 : vector<16x128xi1>, vector<16x128xf32>
    %37 = arith.maximumf %24, %36 : vector<16x128xf32>
    %38 = vector.extract_strided_slice %7 {offsets = [0, 256], sizes = [16, 128], strides = [1, 1]} : vector<16x1152xf32> to vector<16x128xf32>
    %39 = vector.extract_strided_slice %0 {offsets = [2, 0], sizes = [1, 128], strides = [1, 1]} : vector<36x128xf32> to vector<1x128xf32>
    %40 = vector.broadcast %39 : vector<1x128xf32> to vector<16x128xf32>
    %41 = arith.mulf %38, %40 : vector<16x128xf32>
    %42 = arith.addf %29, %41 : vector<16x128xf32>
    %43 = vector.extract_strided_slice %1 {offsets = [2, 0], sizes = [1, 128], strides = [1, 1]} : vector<36x128xf32> to vector<1x128xf32>
    %44 = vector.broadcast %43 : vector<1x128xf32> to vector<16x128xf32>
    %45 = arith.mulf %38, %44 : vector<16x128xf32>
    %46 = arith.addf %33, %45 : vector<16x128xf32>
    %c1_i32_8 = arith.constant 1 : i32
    %47 = vector.broadcast %c1_i32_8 : i32 to vector<16x128xi32>
    %48 = arith.cmpi sge, %2, %47 : vector<16x128xi32>
    %c120_i32 = arith.constant 120 : i32
    %49 = vector.broadcast %c120_i32 : i32 to vector<16x128xi32>
    %50 = arith.cmpi slt, %3, %49 : vector<16x128xi32>
    %51 = arith.andi %48, %50 : vector<16x128xi1>
    %52 = arith.select %51, %38, %8 : vector<16x128xi1>, vector<16x128xf32>
    %53 = arith.maximumf %37, %52 : vector<16x128xf32>
    %54 = vector.extract_strided_slice %7 {offsets = [0, 384], sizes = [16, 128], strides = [1, 1]} : vector<16x1152xf32> to vector<16x128xf32>
    %55 = vector.extract_strided_slice %0 {offsets = [3, 0], sizes = [1, 128], strides = [1, 1]} : vector<36x128xf32> to vector<1x128xf32>
    %56 = vector.broadcast %55 : vector<1x128xf32> to vector<16x128xf32>
    %57 = arith.mulf %54, %56 : vector<16x128xf32>
    %58 = arith.addf %42, %57 : vector<16x128xf32>
    %59 = vector.extract_strided_slice %1 {offsets = [3, 0], sizes = [1, 128], strides = [1, 1]} : vector<36x128xf32> to vector<1x128xf32>
    %60 = vector.broadcast %59 : vector<1x128xf32> to vector<16x128xf32>
    %61 = arith.mulf %54, %60 : vector<16x128xf32>
    %62 = arith.addf %46, %61 : vector<16x128xf32>
    %c8_i32_9 = arith.constant 8 : i32
    %63 = vector.broadcast %c8_i32_9 : i32 to vector<16x128xi32>
    %64 = arith.cmpi sge, %3, %63 : vector<16x128xi32>
    %65 = arith.select %64, %54, %8 : vector<16x128xi1>, vector<16x128xf32>
    %66 = arith.maximumf %53, %65 : vector<16x128xf32>
    %67 = vector.extract_strided_slice %7 {offsets = [0, 512], sizes = [16, 128], strides = [1, 1]} : vector<16x1152xf32> to vector<16x128xf32>
    %68 = vector.extract_strided_slice %0 {offsets = [4, 0], sizes = [1, 128], strides = [1, 1]} : vector<36x128xf32> to vector<1x128xf32>
    %69 = vector.broadcast %68 : vector<1x128xf32> to vector<16x128xf32>
    %70 = arith.mulf %67, %69 : vector<16x128xf32>
    %71 = arith.addf %58, %70 : vector<16x128xf32>
    %72 = vector.extract_strided_slice %1 {offsets = [4, 0], sizes = [1, 128], strides = [1, 1]} : vector<36x128xf32> to vector<1x128xf32>
    %73 = vector.broadcast %72 : vector<1x128xf32> to vector<16x128xf32>
    %74 = arith.mulf %67, %73 : vector<16x128xf32>
    %75 = arith.addf %62, %74 : vector<16x128xf32>
    %76 = vector.extract_strided_slice %7 {offsets = [0, 640], sizes = [16, 128], strides = [1, 1]} : vector<16x1152xf32> to vector<16x128xf32>
    %77 = vector.extract_strided_slice %0 {offsets = [5, 0], sizes = [1, 128], strides = [1, 1]} : vector<36x128xf32> to vector<1x128xf32>
    %78 = vector.broadcast %77 : vector<1x128xf32> to vector<16x128xf32>
    %79 = arith.mulf %76, %78 : vector<16x128xf32>
    %80 = arith.addf %71, %79 : vector<16x128xf32>
    %81 = vector.extract_strided_slice %1 {offsets = [5, 0], sizes = [1, 128], strides = [1, 1]} : vector<36x128xf32> to vector<1x128xf32>
    %82 = vector.broadcast %81 : vector<1x128xf32> to vector<16x128xf32>
    %83 = arith.mulf %76, %82 : vector<16x128xf32>
    %84 = arith.addf %75, %83 : vector<16x128xf32>
    %c120_i32_10 = arith.constant 120 : i32
    %85 = vector.broadcast %c120_i32_10 : i32 to vector<16x128xi32>
    %86 = arith.cmpi slt, %3, %85 : vector<16x128xi32>
    %87 = arith.select %86, %76, %8 : vector<16x128xi1>, vector<16x128xf32>
    %88 = arith.maximumf %66, %87 : vector<16x128xf32>
    %89 = vector.extract_strided_slice %7 {offsets = [0, 768], sizes = [16, 128], strides = [1, 1]} : vector<16x1152xf32> to vector<16x128xf32>
    %90 = vector.extract_strided_slice %0 {offsets = [6, 0], sizes = [1, 128], strides = [1, 1]} : vector<36x128xf32> to vector<1x128xf32>
    %91 = vector.broadcast %90 : vector<1x128xf32> to vector<16x128xf32>
    %92 = arith.mulf %89, %91 : vector<16x128xf32>
    %93 = arith.addf %80, %92 : vector<16x128xf32>
    %94 = vector.extract_strided_slice %1 {offsets = [6, 0], sizes = [1, 128], strides = [1, 1]} : vector<36x128xf32> to vector<1x128xf32>
    %95 = vector.broadcast %94 : vector<1x128xf32> to vector<16x128xf32>
    %96 = arith.mulf %89, %95 : vector<16x128xf32>
    %97 = arith.addf %84, %96 : vector<16x128xf32>
    %c14_i32 = arith.constant 14 : i32
    %98 = vector.broadcast %c14_i32 : i32 to vector<16x128xi32>
    %99 = arith.cmpi sle, %2, %98 : vector<16x128xi32>
    %c8_i32_11 = arith.constant 8 : i32
    %100 = vector.broadcast %c8_i32_11 : i32 to vector<16x128xi32>
    %101 = arith.cmpi sge, %3, %100 : vector<16x128xi32>
    %102 = arith.andi %99, %101 : vector<16x128xi1>
    %103 = arith.select %102, %89, %8 : vector<16x128xi1>, vector<16x128xf32>
    %104 = arith.maximumf %88, %103 : vector<16x128xf32>
    %105 = vector.extract_strided_slice %7 {offsets = [0, 896], sizes = [16, 128], strides = [1, 1]} : vector<16x1152xf32> to vector<16x128xf32>
    %106 = vector.extract_strided_slice %0 {offsets = [7, 0], sizes = [1, 128], strides = [1, 1]} : vector<36x128xf32> to vector<1x128xf32>
    %107 = vector.broadcast %106 : vector<1x128xf32> to vector<16x128xf32>
    %108 = arith.mulf %105, %107 : vector<16x128xf32>
    %109 = arith.addf %93, %108 : vector<16x128xf32>
    %110 = vector.extract_strided_slice %1 {offsets = [7, 0], sizes = [1, 128], strides = [1, 1]} : vector<36x128xf32> to vector<1x128xf32>
    %111 = vector.broadcast %110 : vector<1x128xf32> to vector<16x128xf32>
    %112 = arith.mulf %105, %111 : vector<16x128xf32>
    %113 = arith.addf %97, %112 : vector<16x128xf32>
    %c14_i32_12 = arith.constant 14 : i32
    %114 = vector.broadcast %c14_i32_12 : i32 to vector<16x128xi32>
    %115 = arith.cmpi sle, %2, %114 : vector<16x128xi32>
    %116 = arith.select %115, %105, %8 : vector<16x128xi1>, vector<16x128xf32>
    %117 = arith.maximumf %104, %116 : vector<16x128xf32>
    %118 = vector.extract_strided_slice %7 {offsets = [0, 1024], sizes = [16, 128], strides = [1, 1]} : vector<16x1152xf32> to vector<16x128xf32>
    %119 = vector.extract_strided_slice %0 {offsets = [8, 0], sizes = [1, 128], strides = [1, 1]} : vector<36x128xf32> to vector<1x128xf32>
    %120 = vector.broadcast %119 : vector<1x128xf32> to vector<16x128xf32>
    %121 = arith.mulf %118, %120 : vector<16x128xf32>
    %122 = arith.addf %109, %121 : vector<16x128xf32>
    %123 = vector.extract_strided_slice %1 {offsets = [8, 0], sizes = [1, 128], strides = [1, 1]} : vector<36x128xf32> to vector<1x128xf32>
    %124 = vector.broadcast %123 : vector<1x128xf32> to vector<16x128xf32>
    %125 = arith.mulf %118, %124 : vector<16x128xf32>
    %126 = arith.addf %113, %125 : vector<16x128xf32>
    %c14_i32_13 = arith.constant 14 : i32
    %127 = vector.broadcast %c14_i32_13 : i32 to vector<16x128xi32>
    %128 = arith.cmpi sle, %2, %127 : vector<16x128xi32>
    %c120_i32_14 = arith.constant 120 : i32
    %129 = vector.broadcast %c120_i32_14 : i32 to vector<16x128xi32>
    %130 = arith.cmpi slt, %3, %129 : vector<16x128xi32>
    %131 = arith.andi %128, %130 : vector<16x128xi1>
    %132 = arith.select %131, %118, %8 : vector<16x128xi1>, vector<16x128xf32>
    %133 = arith.maximumf %117, %132 : vector<16x128xf32>
    %c1 = arith.constant 1 : index
    %c0_15 = arith.constant 0 : index
    %c0_16 = arith.constant 0 : index
    %134 = vector.load %arg1[%c1, %c0_15, %c0_16] : memref<4x16x1152xf32, #tpu.memory_space<vmem>>, vector<1x16x1152xf32>
    %135 = vector.shape_cast %134 : vector<1x16x1152xf32> to vector<16x1152xf32>
    %136 = vector.extract_strided_slice %135 {offsets = [0, 0], sizes = [16, 128], strides = [1, 1]} : vector<16x1152xf32> to vector<16x128xf32>
    %137 = vector.extract_strided_slice %0 {offsets = [9, 0], sizes = [1, 128], strides = [1, 1]} : vector<36x128xf32> to vector<1x128xf32>
    %138 = vector.broadcast %137 : vector<1x128xf32> to vector<16x128xf32>
    %139 = arith.mulf %136, %138 : vector<16x128xf32>
    %140 = arith.addf %122, %139 : vector<16x128xf32>
    %141 = vector.extract_strided_slice %1 {offsets = [9, 0], sizes = [1, 128], strides = [1, 1]} : vector<36x128xf32> to vector<1x128xf32>
    %142 = vector.broadcast %141 : vector<1x128xf32> to vector<16x128xf32>
    %143 = arith.mulf %136, %142 : vector<16x128xf32>
    %144 = arith.addf %126, %143 : vector<16x128xf32>
    %145 = vector.extract_strided_slice %135 {offsets = [0, 128], sizes = [16, 128], strides = [1, 1]} : vector<16x1152xf32> to vector<16x128xf32>
    %146 = vector.extract_strided_slice %0 {offsets = [10, 0], sizes = [1, 128], strides = [1, 1]} : vector<36x128xf32> to vector<1x128xf32>
    %147 = vector.broadcast %146 : vector<1x128xf32> to vector<16x128xf32>
    %148 = arith.mulf %145, %147 : vector<16x128xf32>
    %149 = arith.addf %140, %148 : vector<16x128xf32>
    %150 = vector.extract_strided_slice %1 {offsets = [10, 0], sizes = [1, 128], strides = [1, 1]} : vector<36x128xf32> to vector<1x128xf32>
    %151 = vector.broadcast %150 : vector<1x128xf32> to vector<16x128xf32>
    %152 = arith.mulf %145, %151 : vector<16x128xf32>
    %153 = arith.addf %144, %152 : vector<16x128xf32>
    %154 = vector.extract_strided_slice %135 {offsets = [0, 256], sizes = [16, 128], strides = [1, 1]} : vector<16x1152xf32> to vector<16x128xf32>
    %155 = vector.extract_strided_slice %0 {offsets = [11, 0], sizes = [1, 128], strides = [1, 1]} : vector<36x128xf32> to vector<1x128xf32>
    %156 = vector.broadcast %155 : vector<1x128xf32> to vector<16x128xf32>
    %157 = arith.mulf %154, %156 : vector<16x128xf32>
    %158 = arith.addf %149, %157 : vector<16x128xf32>
    %159 = vector.extract_strided_slice %1 {offsets = [11, 0], sizes = [1, 128], strides = [1, 1]} : vector<36x128xf32> to vector<1x128xf32>
    %160 = vector.broadcast %159 : vector<1x128xf32> to vector<16x128xf32>
    %161 = arith.mulf %154, %160 : vector<16x128xf32>
    %162 = arith.addf %153, %161 : vector<16x128xf32>
    %163 = vector.extract_strided_slice %135 {offsets = [0, 384], sizes = [16, 128], strides = [1, 1]} : vector<16x1152xf32> to vector<16x128xf32>
    %164 = vector.extract_strided_slice %0 {offsets = [12, 0], sizes = [1, 128], strides = [1, 1]} : vector<36x128xf32> to vector<1x128xf32>
    %165 = vector.broadcast %164 : vector<1x128xf32> to vector<16x128xf32>
    %166 = arith.mulf %163, %165 : vector<16x128xf32>
    %167 = arith.addf %158, %166 : vector<16x128xf32>
    %168 = vector.extract_strided_slice %1 {offsets = [12, 0], sizes = [1, 128], strides = [1, 1]} : vector<36x128xf32> to vector<1x128xf32>
    %169 = vector.broadcast %168 : vector<1x128xf32> to vector<16x128xf32>
    %170 = arith.mulf %163, %169 : vector<16x128xf32>
    %171 = arith.addf %162, %170 : vector<16x128xf32>
    %172 = vector.extract_strided_slice %135 {offsets = [0, 512], sizes = [16, 128], strides = [1, 1]} : vector<16x1152xf32> to vector<16x128xf32>
    %173 = vector.extract_strided_slice %0 {offsets = [13, 0], sizes = [1, 128], strides = [1, 1]} : vector<36x128xf32> to vector<1x128xf32>
    %174 = vector.broadcast %173 : vector<1x128xf32> to vector<16x128xf32>
    %175 = arith.mulf %172, %174 : vector<16x128xf32>
    %176 = arith.addf %167, %175 : vector<16x128xf32>
    %177 = vector.extract_strided_slice %1 {offsets = [13, 0], sizes = [1, 128], strides = [1, 1]} : vector<36x128xf32> to vector<1x128xf32>
    %178 = vector.broadcast %177 : vector<1x128xf32> to vector<16x128xf32>
    %179 = arith.mulf %172, %178 : vector<16x128xf32>
    %180 = arith.addf %171, %179 : vector<16x128xf32>
    %181 = vector.extract_strided_slice %135 {offsets = [0, 640], sizes = [16, 128], strides = [1, 1]} : vector<16x1152xf32> to vector<16x128xf32>
    %182 = vector.extract_strided_slice %0 {offsets = [14, 0], sizes = [1, 128], strides = [1, 1]} : vector<36x128xf32> to vector<1x128xf32>
    %183 = vector.broadcast %182 : vector<1x128xf32> to vector<16x128xf32>
    %184 = arith.mulf %181, %183 : vector<16x128xf32>
    %185 = arith.addf %176, %184 : vector<16x128xf32>
    %186 = vector.extract_strided_slice %1 {offsets = [14, 0], sizes = [1, 128], strides = [1, 1]} : vector<36x128xf32> to vector<1x128xf32>
    %187 = vector.broadcast %186 : vector<1x128xf32> to vector<16x128xf32>
    %188 = arith.mulf %181, %187 : vector<16x128xf32>
    %189 = arith.addf %180, %188 : vector<16x128xf32>
    %190 = vector.extract_strided_slice %135 {offsets = [0, 768], sizes = [16, 128], strides = [1, 1]} : vector<16x1152xf32> to vector<16x128xf32>
    %191 = vector.extract_strided_slice %0 {offsets = [15, 0], sizes = [1, 128], strides = [1, 1]} : vector<36x128xf32> to vector<1x128xf32>
    %192 = vector.broadcast %191 : vector<1x128xf32> to vector<16x128xf32>
    %193 = arith.mulf %190, %192 : vector<16x128xf32>
    %194 = arith.addf %185, %193 : vector<16x128xf32>
    %195 = vector.extract_strided_slice %1 {offsets = [15, 0], sizes = [1, 128], strides = [1, 1]} : vector<36x128xf32> to vector<1x128xf32>
    %196 = vector.broadcast %195 : vector<1x128xf32> to vector<16x128xf32>
    %197 = arith.mulf %190, %196 : vector<16x128xf32>
    %198 = arith.addf %189, %197 : vector<16x128xf32>
    %199 = vector.extract_strided_slice %135 {offsets = [0, 896], sizes = [16, 128], strides = [1, 1]} : vector<16x1152xf32> to vector<16x128xf32>
    %200 = vector.extract_strided_slice %0 {offsets = [16, 0], sizes = [1, 128], strides = [1, 1]} : vector<36x128xf32> to vector<1x128xf32>
    %201 = vector.broadcast %200 : vector<1x128xf32> to vector<16x128xf32>
    %202 = arith.mulf %199, %201 : vector<16x128xf32>
    %203 = arith.addf %194, %202 : vector<16x128xf32>
    %204 = vector.extract_strided_slice %1 {offsets = [16, 0], sizes = [1, 128], strides = [1, 1]} : vector<36x128xf32> to vector<1x128xf32>
    %205 = vector.broadcast %204 : vector<1x128xf32> to vector<16x128xf32>
    %206 = arith.mulf %199, %205 : vector<16x128xf32>
    %207 = arith.addf %198, %206 : vector<16x128xf32>
    %208 = vector.extract_strided_slice %135 {offsets = [0, 1024], sizes = [16, 128], strides = [1, 1]} : vector<16x1152xf32> to vector<16x128xf32>
    %209 = vector.extract_strided_slice %0 {offsets = [17, 0], sizes = [1, 128], strides = [1, 1]} : vector<36x128xf32> to vector<1x128xf32>
    %210 = vector.broadcast %209 : vector<1x128xf32> to vector<16x128xf32>
    %211 = arith.mulf %208, %210 : vector<16x128xf32>
    %212 = arith.addf %203, %211 : vector<16x128xf32>
    %213 = vector.extract_strided_slice %1 {offsets = [17, 0], sizes = [1, 128], strides = [1, 1]} : vector<36x128xf32> to vector<1x128xf32>
    %214 = vector.broadcast %213 : vector<1x128xf32> to vector<16x128xf32>
    %215 = arith.mulf %208, %214 : vector<16x128xf32>
    %216 = arith.addf %207, %215 : vector<16x128xf32>
    %c2 = arith.constant 2 : index
    %c0_17 = arith.constant 0 : index
    %c0_18 = arith.constant 0 : index
    %217 = vector.load %arg1[%c2, %c0_17, %c0_18] : memref<4x16x1152xf32, #tpu.memory_space<vmem>>, vector<1x16x1152xf32>
    %218 = vector.shape_cast %217 : vector<1x16x1152xf32> to vector<16x1152xf32>
    %219 = vector.extract_strided_slice %218 {offsets = [0, 0], sizes = [16, 128], strides = [1, 1]} : vector<16x1152xf32> to vector<16x128xf32>
    %220 = vector.extract_strided_slice %0 {offsets = [18, 0], sizes = [1, 128], strides = [1, 1]} : vector<36x128xf32> to vector<1x128xf32>
    %221 = vector.broadcast %220 : vector<1x128xf32> to vector<16x128xf32>
    %222 = arith.mulf %219, %221 : vector<16x128xf32>
    %223 = arith.addf %212, %222 : vector<16x128xf32>
    %224 = vector.extract_strided_slice %1 {offsets = [18, 0], sizes = [1, 128], strides = [1, 1]} : vector<36x128xf32> to vector<1x128xf32>
    %225 = vector.broadcast %224 : vector<1x128xf32> to vector<16x128xf32>
    %226 = arith.mulf %219, %225 : vector<16x128xf32>
    %227 = arith.addf %216, %226 : vector<16x128xf32>
    %228 = vector.extract_strided_slice %218 {offsets = [0, 128], sizes = [16, 128], strides = [1, 1]} : vector<16x1152xf32> to vector<16x128xf32>
    %229 = vector.extract_strided_slice %0 {offsets = [19, 0], sizes = [1, 128], strides = [1, 1]} : vector<36x128xf32> to vector<1x128xf32>
    %230 = vector.broadcast %229 : vector<1x128xf32> to vector<16x128xf32>
    %231 = arith.mulf %228, %230 : vector<16x128xf32>
    %232 = arith.addf %223, %231 : vector<16x128xf32>
    %233 = vector.extract_strided_slice %1 {offsets = [19, 0], sizes = [1, 128], strides = [1, 1]} : vector<36x128xf32> to vector<1x128xf32>
    %234 = vector.broadcast %233 : vector<1x128xf32> to vector<16x128xf32>
    %235 = arith.mulf %228, %234 : vector<16x128xf32>
    %236 = arith.addf %227, %235 : vector<16x128xf32>
    %237 = vector.extract_strided_slice %218 {offsets = [0, 256], sizes = [16, 128], strides = [1, 1]} : vector<16x1152xf32> to vector<16x128xf32>
    %238 = vector.extract_strided_slice %0 {offsets = [20, 0], sizes = [1, 128], strides = [1, 1]} : vector<36x128xf32> to vector<1x128xf32>
    %239 = vector.broadcast %238 : vector<1x128xf32> to vector<16x128xf32>
    %240 = arith.mulf %237, %239 : vector<16x128xf32>
    %241 = arith.addf %232, %240 : vector<16x128xf32>
    %242 = vector.extract_strided_slice %1 {offsets = [20, 0], sizes = [1, 128], strides = [1, 1]} : vector<36x128xf32> to vector<1x128xf32>
    %243 = vector.broadcast %242 : vector<1x128xf32> to vector<16x128xf32>
    %244 = arith.mulf %237, %243 : vector<16x128xf32>
    %245 = arith.addf %236, %244 : vector<16x128xf32>
    %246 = vector.extract_strided_slice %218 {offsets = [0, 384], sizes = [16, 128], strides = [1, 1]} : vector<16x1152xf32> to vector<16x128xf32>
    %247 = vector.extract_strided_slice %0 {offsets = [21, 0], sizes = [1, 128], strides = [1, 1]} : vector<36x128xf32> to vector<1x128xf32>
    %248 = vector.broadcast %247 : vector<1x128xf32> to vector<16x128xf32>
    %249 = arith.mulf %246, %248 : vector<16x128xf32>
    %250 = arith.addf %241, %249 : vector<16x128xf32>
    %251 = vector.extract_strided_slice %1 {offsets = [21, 0], sizes = [1, 128], strides = [1, 1]} : vector<36x128xf32> to vector<1x128xf32>
    %252 = vector.broadcast %251 : vector<1x128xf32> to vector<16x128xf32>
    %253 = arith.mulf %246, %252 : vector<16x128xf32>
    %254 = arith.addf %245, %253 : vector<16x128xf32>
    %255 = vector.extract_strided_slice %218 {offsets = [0, 512], sizes = [16, 128], strides = [1, 1]} : vector<16x1152xf32> to vector<16x128xf32>
    %256 = vector.extract_strided_slice %0 {offsets = [22, 0], sizes = [1, 128], strides = [1, 1]} : vector<36x128xf32> to vector<1x128xf32>
    %257 = vector.broadcast %256 : vector<1x128xf32> to vector<16x128xf32>
    %258 = arith.mulf %255, %257 : vector<16x128xf32>
    %259 = arith.addf %250, %258 : vector<16x128xf32>
    %260 = vector.extract_strided_slice %1 {offsets = [22, 0], sizes = [1, 128], strides = [1, 1]} : vector<36x128xf32> to vector<1x128xf32>
    %261 = vector.broadcast %260 : vector<1x128xf32> to vector<16x128xf32>
    %262 = arith.mulf %255, %261 : vector<16x128xf32>
    %263 = arith.addf %254, %262 : vector<16x128xf32>
    %264 = vector.extract_strided_slice %218 {offsets = [0, 640], sizes = [16, 128], strides = [1, 1]} : vector<16x1152xf32> to vector<16x128xf32>
    %265 = vector.extract_strided_slice %0 {offsets = [23, 0], sizes = [1, 128], strides = [1, 1]} : vector<36x128xf32> to vector<1x128xf32>
    %266 = vector.broadcast %265 : vector<1x128xf32> to vector<16x128xf32>
    %267 = arith.mulf %264, %266 : vector<16x128xf32>
    %268 = arith.addf %259, %267 : vector<16x128xf32>
    %269 = vector.extract_strided_slice %1 {offsets = [23, 0], sizes = [1, 128], strides = [1, 1]} : vector<36x128xf32> to vector<1x128xf32>
    %270 = vector.broadcast %269 : vector<1x128xf32> to vector<16x128xf32>
    %271 = arith.mulf %264, %270 : vector<16x128xf32>
    %272 = arith.addf %263, %271 : vector<16x128xf32>
    %273 = vector.extract_strided_slice %218 {offsets = [0, 768], sizes = [16, 128], strides = [1, 1]} : vector<16x1152xf32> to vector<16x128xf32>
    %274 = vector.extract_strided_slice %0 {offsets = [24, 0], sizes = [1, 128], strides = [1, 1]} : vector<36x128xf32> to vector<1x128xf32>
    %275 = vector.broadcast %274 : vector<1x128xf32> to vector<16x128xf32>
    %276 = arith.mulf %273, %275 : vector<16x128xf32>
    %277 = arith.addf %268, %276 : vector<16x128xf32>
    %278 = vector.extract_strided_slice %1 {offsets = [24, 0], sizes = [1, 128], strides = [1, 1]} : vector<36x128xf32> to vector<1x128xf32>
    %279 = vector.broadcast %278 : vector<1x128xf32> to vector<16x128xf32>
    %280 = arith.mulf %273, %279 : vector<16x128xf32>
    %281 = arith.addf %272, %280 : vector<16x128xf32>
    %282 = vector.extract_strided_slice %218 {offsets = [0, 896], sizes = [16, 128], strides = [1, 1]} : vector<16x1152xf32> to vector<16x128xf32>
    %283 = vector.extract_strided_slice %0 {offsets = [25, 0], sizes = [1, 128], strides = [1, 1]} : vector<36x128xf32> to vector<1x128xf32>
    %284 = vector.broadcast %283 : vector<1x128xf32> to vector<16x128xf32>
    %285 = arith.mulf %282, %284 : vector<16x128xf32>
    %286 = arith.addf %277, %285 : vector<16x128xf32>
    %287 = vector.extract_strided_slice %1 {offsets = [25, 0], sizes = [1, 128], strides = [1, 1]} : vector<36x128xf32> to vector<1x128xf32>
    %288 = vector.broadcast %287 : vector<1x128xf32> to vector<16x128xf32>
    %289 = arith.mulf %282, %288 : vector<16x128xf32>
    %290 = arith.addf %281, %289 : vector<16x128xf32>
    %291 = vector.extract_strided_slice %218 {offsets = [0, 1024], sizes = [16, 128], strides = [1, 1]} : vector<16x1152xf32> to vector<16x128xf32>
    %292 = vector.extract_strided_slice %0 {offsets = [26, 0], sizes = [1, 128], strides = [1, 1]} : vector<36x128xf32> to vector<1x128xf32>
    %293 = vector.broadcast %292 : vector<1x128xf32> to vector<16x128xf32>
    %294 = arith.mulf %291, %293 : vector<16x128xf32>
    %295 = arith.addf %286, %294 : vector<16x128xf32>
    %296 = vector.extract_strided_slice %1 {offsets = [26, 0], sizes = [1, 128], strides = [1, 1]} : vector<36x128xf32> to vector<1x128xf32>
    %297 = vector.broadcast %296 : vector<1x128xf32> to vector<16x128xf32>
    %298 = arith.mulf %291, %297 : vector<16x128xf32>
    %299 = arith.addf %290, %298 : vector<16x128xf32>
    %c3 = arith.constant 3 : index
    %c0_19 = arith.constant 0 : index
    %c0_20 = arith.constant 0 : index
    %300 = vector.load %arg1[%c3, %c0_19, %c0_20] : memref<4x16x1152xf32, #tpu.memory_space<vmem>>, vector<1x16x1152xf32>
    %301 = vector.shape_cast %300 : vector<1x16x1152xf32> to vector<16x1152xf32>
    %302 = vector.extract_strided_slice %301 {offsets = [0, 0], sizes = [16, 128], strides = [1, 1]} : vector<16x1152xf32> to vector<16x128xf32>
    %303 = vector.extract_strided_slice %0 {offsets = [27, 0], sizes = [1, 128], strides = [1, 1]} : vector<36x128xf32> to vector<1x128xf32>
    %304 = vector.broadcast %303 : vector<1x128xf32> to vector<16x128xf32>
    %305 = arith.mulf %302, %304 : vector<16x128xf32>
    %306 = arith.addf %295, %305 : vector<16x128xf32>
    %307 = vector.extract_strided_slice %1 {offsets = [27, 0], sizes = [1, 128], strides = [1, 1]} : vector<36x128xf32> to vector<1x128xf32>
    %308 = vector.broadcast %307 : vector<1x128xf32> to vector<16x128xf32>
    %309 = arith.mulf %302, %308 : vector<16x128xf32>
    %310 = arith.addf %299, %309 : vector<16x128xf32>
    %311 = vector.extract_strided_slice %301 {offsets = [0, 128], sizes = [16, 128], strides = [1, 1]} : vector<16x1152xf32> to vector<16x128xf32>
    %312 = vector.extract_strided_slice %0 {offsets = [28, 0], sizes = [1, 128], strides = [1, 1]} : vector<36x128xf32> to vector<1x128xf32>
    %313 = vector.broadcast %312 : vector<1x128xf32> to vector<16x128xf32>
    %314 = arith.mulf %311, %313 : vector<16x128xf32>
    %315 = arith.addf %306, %314 : vector<16x128xf32>
    %316 = vector.extract_strided_slice %1 {offsets = [28, 0], sizes = [1, 128], strides = [1, 1]} : vector<36x128xf32> to vector<1x128xf32>
    %317 = vector.broadcast %316 : vector<1x128xf32> to vector<16x128xf32>
    %318 = arith.mulf %311, %317 : vector<16x128xf32>
    %319 = arith.addf %310, %318 : vector<16x128xf32>
    %320 = vector.extract_strided_slice %301 {offsets = [0, 256], sizes = [16, 128], strides = [1, 1]} : vector<16x1152xf32> to vector<16x128xf32>
    %321 = vector.extract_strided_slice %0 {offsets = [29, 0], sizes = [1, 128], strides = [1, 1]} : vector<36x128xf32> to vector<1x128xf32>
    %322 = vector.broadcast %321 : vector<1x128xf32> to vector<16x128xf32>
    %323 = arith.mulf %320, %322 : vector<16x128xf32>
    %324 = arith.addf %315, %323 : vector<16x128xf32>
    %325 = vector.extract_strided_slice %1 {offsets = [29, 0], sizes = [1, 128], strides = [1, 1]} : vector<36x128xf32> to vector<1x128xf32>
    %326 = vector.broadcast %325 : vector<1x128xf32> to vector<16x128xf32>
    %327 = arith.mulf %320, %326 : vector<16x128xf32>
    %328 = arith.addf %319, %327 : vector<16x128xf32>
    %329 = vector.extract_strided_slice %301 {offsets = [0, 384], sizes = [16, 128], strides = [1, 1]} : vector<16x1152xf32> to vector<16x128xf32>
    %330 = vector.extract_strided_slice %0 {offsets = [30, 0], sizes = [1, 128], strides = [1, 1]} : vector<36x128xf32> to vector<1x128xf32>
    %331 = vector.broadcast %330 : vector<1x128xf32> to vector<16x128xf32>
    %332 = arith.mulf %329, %331 : vector<16x128xf32>
    %333 = arith.addf %324, %332 : vector<16x128xf32>
    %334 = vector.extract_strided_slice %1 {offsets = [30, 0], sizes = [1, 128], strides = [1, 1]} : vector<36x128xf32> to vector<1x128xf32>
    %335 = vector.broadcast %334 : vector<1x128xf32> to vector<16x128xf32>
    %336 = arith.mulf %329, %335 : vector<16x128xf32>
    %337 = arith.addf %328, %336 : vector<16x128xf32>
    %338 = vector.extract_strided_slice %301 {offsets = [0, 512], sizes = [16, 128], strides = [1, 1]} : vector<16x1152xf32> to vector<16x128xf32>
    %339 = vector.extract_strided_slice %0 {offsets = [31, 0], sizes = [1, 128], strides = [1, 1]} : vector<36x128xf32> to vector<1x128xf32>
    %340 = vector.broadcast %339 : vector<1x128xf32> to vector<16x128xf32>
    %341 = arith.mulf %338, %340 : vector<16x128xf32>
    %342 = arith.addf %333, %341 : vector<16x128xf32>
    %343 = vector.extract_strided_slice %1 {offsets = [31, 0], sizes = [1, 128], strides = [1, 1]} : vector<36x128xf32> to vector<1x128xf32>
    %344 = vector.broadcast %343 : vector<1x128xf32> to vector<16x128xf32>
    %345 = arith.mulf %338, %344 : vector<16x128xf32>
    %346 = arith.addf %337, %345 : vector<16x128xf32>
    %347 = vector.extract_strided_slice %301 {offsets = [0, 640], sizes = [16, 128], strides = [1, 1]} : vector<16x1152xf32> to vector<16x128xf32>
    %348 = vector.extract_strided_slice %0 {offsets = [32, 0], sizes = [1, 128], strides = [1, 1]} : vector<36x128xf32> to vector<1x128xf32>
    %349 = vector.broadcast %348 : vector<1x128xf32> to vector<16x128xf32>
    %350 = arith.mulf %347, %349 : vector<16x128xf32>
    %351 = arith.addf %342, %350 : vector<16x128xf32>
    %352 = vector.extract_strided_slice %1 {offsets = [32, 0], sizes = [1, 128], strides = [1, 1]} : vector<36x128xf32> to vector<1x128xf32>
    %353 = vector.broadcast %352 : vector<1x128xf32> to vector<16x128xf32>
    %354 = arith.mulf %347, %353 : vector<16x128xf32>
    %355 = arith.addf %346, %354 : vector<16x128xf32>
    %356 = vector.extract_strided_slice %301 {offsets = [0, 768], sizes = [16, 128], strides = [1, 1]} : vector<16x1152xf32> to vector<16x128xf32>
    %357 = vector.extract_strided_slice %0 {offsets = [33, 0], sizes = [1, 128], strides = [1, 1]} : vector<36x128xf32> to vector<1x128xf32>
    %358 = vector.broadcast %357 : vector<1x128xf32> to vector<16x128xf32>
    %359 = arith.mulf %356, %358 : vector<16x128xf32>
    %360 = arith.addf %351, %359 : vector<16x128xf32>
    %361 = vector.extract_strided_slice %1 {offsets = [33, 0], sizes = [1, 128], strides = [1, 1]} : vector<36x128xf32> to vector<1x128xf32>
    %362 = vector.broadcast %361 : vector<1x128xf32> to vector<16x128xf32>
    %363 = arith.mulf %356, %362 : vector<16x128xf32>
    %364 = arith.addf %355, %363 : vector<16x128xf32>
    %365 = vector.extract_strided_slice %301 {offsets = [0, 896], sizes = [16, 128], strides = [1, 1]} : vector<16x1152xf32> to vector<16x128xf32>
    %366 = vector.extract_strided_slice %0 {offsets = [34, 0], sizes = [1, 128], strides = [1, 1]} : vector<36x128xf32> to vector<1x128xf32>
    %367 = vector.broadcast %366 : vector<1x128xf32> to vector<16x128xf32>
    %368 = arith.mulf %365, %367 : vector<16x128xf32>
    %369 = arith.addf %360, %368 : vector<16x128xf32>
    %370 = vector.extract_strided_slice %1 {offsets = [34, 0], sizes = [1, 128], strides = [1, 1]} : vector<36x128xf32> to vector<1x128xf32>
    %371 = vector.broadcast %370 : vector<1x128xf32> to vector<16x128xf32>
    %372 = arith.mulf %365, %371 : vector<16x128xf32>
    %373 = arith.addf %364, %372 : vector<16x128xf32>
    %374 = vector.extract_strided_slice %301 {offsets = [0, 1024], sizes = [16, 128], strides = [1, 1]} : vector<16x1152xf32> to vector<16x128xf32>
    %375 = vector.extract_strided_slice %0 {offsets = [35, 0], sizes = [1, 128], strides = [1, 1]} : vector<36x128xf32> to vector<1x128xf32>
    %376 = vector.broadcast %375 : vector<1x128xf32> to vector<16x128xf32>
    %377 = arith.mulf %374, %376 : vector<16x128xf32>
    %378 = arith.addf %369, %377 : vector<16x128xf32>
    %379 = vector.extract_strided_slice %1 {offsets = [35, 0], sizes = [1, 128], strides = [1, 1]} : vector<36x128xf32> to vector<1x128xf32>
    %380 = vector.broadcast %379 : vector<1x128xf32> to vector<16x128xf32>
    %381 = arith.mulf %374, %380 : vector<16x128xf32>
    %382 = arith.addf %373, %381 : vector<16x128xf32>
    %cst_21 = arith.constant dense<0.000000e+00> : vector<128xf32>
    %383 = vector.multi_reduction <add>, %382, %cst_21 [0] : vector<16x128xf32> to vector<128xf32>
    %384 = vector.shape_cast %383 : vector<128xf32> to vector<1x128xf32>
    %385 = arith.mulf %382, %382 : vector<16x128xf32>
    %cst_22 = arith.constant dense<0.000000e+00> : vector<128xf32>
    %386 = vector.multi_reduction <add>, %385, %cst_22 [0] : vector<16x128xf32> to vector<128xf32>
    %387 = vector.shape_cast %386 : vector<128xf32> to vector<1x128xf32>
    %388 = tpu.concatenate %384, %387 in 0 : vector<1x128xf32>, vector<1x128xf32> -> vector<2x128xf32>
    %c0_23 = arith.constant 0 : index
    %c0_24 = arith.constant 0 : index
    %389 = vector.load %arg6[%c0_23, %c0_24] : memref<128x8xf32, #tpu.memory_space<vmem>>, vector<128x8xf32>
    %cst_25 = arith.constant dense<0.000000e+00> : vector<2x8xf32>
    %390 = tpu.matmul %388, %389, %cst_25 {dimension_numbers = #tpu.dot_dimension_numbers<[1], [0], [0], [1], [0, 0, 1, 1], [], []>, precision = #tpu.contract_precision<fp32>} : vector<2x128xf32>, vector<128x8xf32>, vector<2x8xf32> -> vector<2x8xf32>
    %c0_26 = arith.constant 0 : index
    %c0_27 = arith.constant 0 : index
    %391 = vector.load %arg7[%c0_26, %c0_27] : memref<8x128xf32, #tpu.memory_space<vmem>>, vector<8x128xf32>
    %cst_28 = arith.constant dense<0.000000e+00> : vector<2x128xf32>
    %392 = tpu.matmul %390, %391, %cst_28 {dimension_numbers = #tpu.dot_dimension_numbers<[1], [0], [0], [1], [0, 0, 1, 1], [], []>, precision = #tpu.contract_precision<fp32>} : vector<2x8xf32>, vector<8x128xf32>, vector<2x128xf32> -> vector<2x128xf32>
    %393 = vector.extract_strided_slice %392 {offsets = [0, 0], sizes = [1, 128], strides = [1, 1]} : vector<2x128xf32> to vector<1x128xf32>
    %394 = vector.extract_strided_slice %392 {offsets = [1, 0], sizes = [1, 128], strides = [1, 1]} : vector<2x128xf32> to vector<1x128xf32>
    %395 = arith.mulf %393, %393 : vector<1x128xf32>
    %396 = arith.subf %394, %395 : vector<1x128xf32>
    %cst_29 = arith.constant 9.99999974E-6 : f32
    %397 = vector.broadcast %cst_29 : f32 to vector<1x128xf32>
    %398 = arith.addf %396, %397 : vector<1x128xf32>
    %399 = math.rsqrt %398 : vector<1x128xf32>
    %400 = vector.broadcast %393 : vector<1x128xf32> to vector<16x128xf32>
    %401 = arith.subf %382, %400 : vector<16x128xf32>
    %c0_30 = arith.constant 0 : index
    %c0_31 = arith.constant 0 : index
    %402 = vector.load %arg4[%c0_30, %c0_31] : memref<1x128xf32, #tpu.memory_space<vmem>>, vector<1x128xf32>
    %403 = arith.mulf %399, %402 : vector<1x128xf32>
    %404 = vector.broadcast %403 : vector<1x128xf32> to vector<16x128xf32>
    %405 = arith.mulf %401, %404 : vector<16x128xf32>
    %c0_32 = arith.constant 0 : index
    %c0_33 = arith.constant 0 : index
    %406 = vector.load %arg5[%c0_32, %c0_33] : memref<1x128xf32, #tpu.memory_space<vmem>>, vector<1x128xf32>
    %407 = vector.broadcast %406 : vector<1x128xf32> to vector<16x128xf32>
    %408 = arith.addf %405, %407 : vector<16x128xf32>
    %c0_34 = arith.constant 0 : index
    %409 = memref.load %arg0[%c0_34] : memref<1xf32, #tpu.memory_space<smem>>
    %410 = vector.broadcast %409 : f32 to vector<16x128xf32>
    %411 = arith.mulf %410, %133 : vector<16x128xf32>
    %412 = arith.addf %378, %411 : vector<16x128xf32>
    %413 = arith.addf %412, %408 : vector<16x128xf32>
    %c0_35 = arith.constant 0 : index
    %c0_36 = arith.constant 0 : index
    %414 = vector.load %arg8[%c0_35, %c0_36] : memref<16x128xf32, #tpu.memory_space<vmem>>, vector<16x128xf32>
    tpu.vector_store %arg8[%c0_35, %c0_36], %413 {strides = array<i32>} : memref<16x128xf32, #tpu.memory_space<vmem>>, vector<16x128xf32>,
    return
  }
}

</mosaic_0001>

<bundles_post_ra>
// kernel: searchable_operation_forward.1
= control target key start
LH: loop header
LB: loop body
LE: loop exit
PB: predicated region body
PF: predicated region fallthrough
CT: control target
= control target key end

     0   :  { %vm542_vm0 = vcmask 1040384   ;;  %vm902_vm1 = vcmask 64512   ;;  %s2278_s6 = inlined_call_operand.vmem [shape: f32[128,8], index: 6, kind: input, shape index: {}]   ;;  %s2279_s3 = inlined_call_operand.vmem [shape: f32[36,128], index: 3, kind: input, shape index: {}]   ;;  %s2280_s1 = inlined_call_operand.vmem [shape: f32[4,16,1152], index: 1, kind: input, shape index: {}]   ;;  %s2281_s7 = inlined_call_operand.vmem [shape: f32[8,128], index: 7, kind: input, shape index: {}]   ;;  %s2282_s4 = inlined_call_operand.vmem [shape: f32[1,128], index: 4, kind: input, shape index: {}]   ;;  %s2283_s5 = inlined_call_operand.vmem [shape: f32[1,128], index: 5, kind: input, shape index: {}]   ;;  %s2284_s2 = inlined_call_operand.vmem [shape: f32[36,128], index: 2, kind: input, shape index: {}]   ;;  %s2285_s0 = inlined_call_operand.<no memory space> [shape: f32[1], index: 0, kind: input, shape index: {}]   ;;  %s2286_s8 = inlined_call_operand.vmem [shape: f32[16,128], index: 8, kind: output, shape index: {}]  }
   0x1   :  { %v559_v0 = vld [vmem:[%s2278_s6 + $0x78] sm:$0xff]  ;;  %v558_v1 = vld [vmem:[%s2278_s6 + $0x70] sm:$0xff]  ;;  %v557_v2 = vld [vmem:[%s2278_s6 + $0x68] sm:$0xff] }
   0x2   :  { %v1229_v3 = vand.u32 4294901760, %v559_v0  ;;  %v1231_v4 = vand.u32 4294901760, %v558_v1  ;;  %v1233_v5 = vand.u32 4294901760, %v557_v2  ;;  %v556_v6 = vld [vmem:[%s2278_s6 + $0x60] sm:$0xff]  ;;  %v555_v7 = vld [vmem:[%s2278_s6 + $0x58] sm:$0xff]  ;;  %v554_v8 = vld [vmem:[%s2278_s6 + $0x50] sm:$0xff] }
   0x3   :  { %v1244_v9 = vand.u32 4294901760, %v556_v6  ;;  %v1246_v10 = vand.u32 4294901760, %v555_v7  ;;  %v1248_v11 = vand.u32 4294901760, %v554_v8  ;;  %v553_v12 = vld [vmem:[%s2278_s6 + $0x48] sm:$0xff]  ;;  %v552_v13 = vld [vmem:[%s2278_s6 + $0x40] sm:$0xff]  ;;  %v551_v21 = vld [vmem:[%s2278_s6 + $0x38] sm:$0xff] }
   0x4   :  { %561 = vmatpush.msra.mxu0 %v1229_v3  ;;  %v1258_v14 = vsub.f32 %v559_v0, %v1229_v3  ;;  %v1261_v15 = vsub.f32 %v558_v1, %v1231_v4  ;;  %v1264_v16 = vsub.f32 %v557_v2, %v1233_v5  ;;  %v1266_v17 = vand.u32 4294901760, %v553_v12  ;;  %757 = vmatpush.msra.mxu3 %v1229_v3  ;;  %v550_v34 = vld [vmem:[%s2278_s6 + $0x30] sm:$0xff]  ;;  %v549_v35 = vld [vmem:[%s2278_s6 + $0x28] sm:$0xff]  ;;  %v548_v40 = vld [vmem:[%s2278_s6 + $0x20] sm:$0xff] }
   0x5   :  { %v1270_v18 = vsub.f32 %v556_v6, %v1244_v9  ;;  %v1273_v19 = vsub.f32 %v555_v7, %v1246_v10  ;;  %v1275_v20 = vand.u32 4294901760, %v552_v13  ;;  %v1285_v25 = vsub.f32 %v554_v8, %v1248_v11  ;;  %v547_v41 = vld [vmem:[%s2278_s6 + $0x18] sm:$0xff]  ;;  %v546_v42 = vld [vmem:[%s2278_s6 + $0x10] sm:$0xff]  ;;  %v545_v57 = vld [vmem:[%s2278_s6 + $0x8] sm:$0xff] }
   0x6   :  { %563 = vmatpush.msra.mxu0 %v1231_v4  ;;  %v2298_v22 = vand.u32 4294901760, %v1258_v14  ;;  %v2297_v23 = vand.u32 4294901760, %v1261_v15  ;;  %v2296_v24 = vand.u32 4294901760, %v1264_v16  ;;  %704 = vmatpush.msra.mxu2 %v1258_v14  ;;  %v1291_v28 = vsub.f32 %v553_v12, %v1266_v17  ;;  %v544_v63 = vld [vmem:[%s2278_s6] sm:$0xff] }
   0x7   :  { %v2295_v26 = vand.u32 4294901760, %v1270_v18  ;;  %v2293_v27 = vand.u32 4294901760, %v1273_v19  ;;  %759 = vmatpush.msra.mxu3 %v1231_v4  ;;  %v1304_v32 = vand.u32 4294901760, %v551_v21  ;;  %v1308_v33 = vsub.f32 %v552_v13, %v1275_v20  ;;  %v1399_v7 = vld [vmem:[%s2279_s3] sm:$0xff] }
   0x8   :  { %v604_v29 = vsub.f32 %v1258_v14, %v2298_v22  ;;  %565 = vmatpush.msra.mxu0 %v1233_v5  ;;  %v610_v30 = vsub.f32 %v1261_v15, %v2297_v23  ;;  %v616_v31 = vsub.f32 %v1264_v16, %v2296_v24  ;;  %707 = vmatpush.msra.mxu2 %v1261_v15  ;;  %v2292_v39 = vand.u32 4294901760, %v1285_v25  ;;  %v1512_v23 = vld [vmem:[%s2280_s1 + $0x28] sm:$0xff] }
   0x9   :  { %761 = vmatpush.msra.mxu3 %v1233_v5  ;;  %v622_v38 = vsub.f32 %v1270_v18, %v2295_v26  ;;  %v628_v44 = vsub.f32 %v1273_v19, %v2293_v27  ;;  %v2291_v45 = vand.u32 4294901760, %v1291_v28  ;;  %v2290_v46 = vand.u32 4294901760, %v1308_v33  ;;  %2337 = vst [vmem:[#allocation9_spill] sm:$0xff] %v1512_v23 }
   0xa   :  { %v605_v36 = vand.u32 4294901760, %v604_v29  ;;  %v611_v37 = vand.u32 4294901760, %v610_v30  ;;  %567 = vmatpush.msra.mxu0 %v1244_v9  ;;  %710 = vmatpush.msra.mxu2 %v1264_v16  ;;  %v617_v43 = vand.u32 4294901760, %v616_v31  ;;  %v1339_v47 = vand.u32 4294901760, %v550_v34  ;;  %v1410_v29 = vld [vmem:[%s2280_s1] sm:$0xff]  ;;  %v1415_v30 = vld [vmem:[%s2280_s1 + $0x48] sm:$0xff] }
   0xb   :  { %763 = vmatpush.msra.mxu3 %v1244_v9  ;;  %v1342_v48 = vsub.f32 %v551_v21, %v1304_v32  ;;  %v1344_v49 = vand.u32 4294901760, %v549_v35  ;;  %v1346_v50 = vand.u32 4294901760, %v548_v40  ;;  %v1348_v51 = vand.u32 4294901760, %v547_v41 }
   0xc   :  { %606 = vmatpush.msra.mxu1 %v605_v36  ;;  %569 = vmatpush.msra.mxu0 %v1246_v10  ;;  %v1351_v52 = vand.u32 4294901760, %v546_v42  ;;  %v623_v53 = vand.u32 4294901760, %v622_v38  ;;  %v634_v54 = vsub.f32 %v1285_v25, %v2292_v39  ;;  %v1359_v55 = vsub.f32 %v550_v34, %v1339_v47 }
   0xd   :  { %713 = vmatpush.msra.mxu2 %v1270_v18  ;;  %765 = vmatpush.msra.mxu3 %v1246_v10  ;;  %v1362_v56 = vsub.f32 %v549_v35, %v1344_v49  ;;  %v640_v58 = vsub.f32 %v1291_v28, %v2291_v45  ;;  %v629_v59 = vand.u32 4294901760, %v628_v44  ;;  %v1376_v60 = vsub.f32 %v1308_v33, %v2290_v46  ;;  %v1492_v45 = vld [vmem:[%s2280_s1 + $0x20] sm:$0xff] }
   0xe   :  { %612 = vmatpush.msra.mxu1 %v611_v37  ;;  %571 = vmatpush.msra.mxu0 %v1248_v11  ;;  %v2289_v61 = vand.u32 4294901760, %v1342_v48  ;;  %v1380_v62 = vsub.f32 %v548_v40, %v1346_v50  ;;  %v2288_v0 = vand.u32 4294901760, %v1359_v55  ;;  %v1387_v1 = vsub.f32 %v547_v41, %v1348_v51  ;;  %2335 = vst [vmem:[#allocation7_spill] sm:$0xff] %v1492_v45 }
   0xf   :  { %716 = vmatpush.msra.mxu2 %v1273_v19  ;;  %767 = vmatpush.msra.mxu3 %v1248_v11  ;;  %v1389_v2 = vand.u32 4294901760, %v545_v57  ;;  %v1392_v6 = vsub.f32 %v546_v42, %v1351_v52  ;;  %v635_v8 = vand.u32 4294901760, %v634_v54  ;;  %v2287_v12 = vand.u32 4294901760, %v1362_v56  ;;  %v1439_v42 = vld [vmem:[%s2280_s1 + $0x8] sm:$0xff]  ;;  %v1460_v54 = vld [vmem:[%s2280_s1 + $0x18] sm:$0xff] }
  0x10   :  { %618 = vmatpush.msra.mxu1 %v617_v43  ;;  %573 = vmatpush.msra.mxu0 %v1266_v17  ;;  %v641_v13 = vand.u32 4294901760, %v640_v58  ;;  %v1403_v21 = vand.u32 4294901760, %v544_v63  ;;  %v647_v31 = vand.u32 4294901760, %v1376_v60  ;;  %v652_v34 = vsub.f32 %v1342_v48, %v2289_v61  ;;  %v1444_v43 = vld [vmem:[%s2280_s1 + $0x50] sm:$0xff]  ;;  %2332 = vst [vmem:[#allocation4_spill] sm:$0xff] %v1460_v54 }
  0x11   :  { %719 = vmatpush.msra.mxu2 %v1285_v25  ;;  %769 = vmatpush.msra.mxu3 %v1266_v17  ;;  %v2294_v35 = vand.u32 4294901760, %v1380_v62  ;;  %v68_v36 = vperm.slane %v1399_v7, 0  ;;  %v1427_v37 = vsub.f32 %v1359_v55, %v2288_v0  ;;  %v1432_v41 = vsub.f32 %v545_v57, %v1389_v2  ;;  %v1465_v57 = vld [vmem:[%s2280_s1 + $0x58] sm:$0xff] }
  0x12   :  { %624 = vmatpush.msra.mxu1 %v623_v53  ;;  %575 = vmatpush.msra.mxu0 %v1275_v20  ;;  %v1450_v44 = vsub.f32 %v1362_v56, %v2287_v12  ;;  %v1455_v53 = vld [vmem:[%s2280_s1 + $0x10] sm:$0xff]  ;;  %2333 = vst [vmem:[#allocation5_spill] sm:$0xff] %v1465_v57  ;;  %v87_v60 = vperm.slane %v1399_v7, 1  ;;  %v1478_v12 = vld [vmem:[%s2280_s1 + $0x60] sm:$0xff]  ;;  %v101_v0 = vperm.slane %v1399_v7, 2  ;;  %v118_v61 = vperm.slane %v1399_v7, 3 }
  0x13   :  { %722 = vmatpush.msra.mxu2 %v1291_v28  ;;  %771 = vmatpush.msra.mxu3 %v1275_v20  ;;  %2331 = vst [vmem:[#allocation3_spill] sm:$0xff] %v1455_v53  ;;  %v69_v58 = vmul.f32 %v68_v36, %v1410_v29  ;;  %v653_v46 = vand.u32 4294901760, %v652_v34  ;;  %v142_v24 = vperm.slane %v1399_v7, 5 }
  0x14   :  { %630 = vmatpush.msra.mxu1 %v629_v59  ;;  %577 = vmatpush.msra.mxu0 %v1304_v32  ;;  %v70_v59 = vmul.f32 %v68_v36, %v1415_v30  ;;  %2334 = vst [vmem:[#allocation6_spill] sm:$0xff] %v1478_v12  ;;  %v132_v36 = vperm.slane %v1399_v7, 4  ;;  %v88_v39 = vmul.f32 %v87_v60, %v1439_v42 }
  0x15   :  { %725 = vmatpush.msra.mxu2 %v1308_v33  ;;  %773 = vmatpush.msra.mxu3 %v1304_v32  ;;  %v89_v27 = vmul.f32 %v87_v60, %v1444_v43  ;;  %v102_v34 = vmul.f32 %v101_v0, %v1455_v53  ;;  %v119_v26 = vmul.f32 %v118_v61, %v1460_v54  ;;  %v659_v60 = vand.u32 4294901760, %v1427_v37  ;;  %v1533_v37 = vld [vmem:[%s2280_s1 + $0x30] sm:$0xff] }
  0x16   :  { %636 = vmatpush.msra.mxu1 %v635_v8  ;;  %579 = vmatpush.msra.mxu0 %v1339_v47  ;;  %v1471_v8 = vsub.f32 %v544_v63, %v1403_v21  ;;  %v1487_v63 = vsub.f32 %v1380_v62, %v2294_v35  ;;  %v103_v35 = vmul.f32 %v101_v0, %v1465_v57  ;;  %v2338_v0 = vand.u32 4294901760, %v1387_v1 }
  0x17   :  { %728 = vmatpush.msra.mxu2 %v1342_v48  ;;  %775 = vmatpush.msra.mxu3 %v1339_v47  ;;  %v90_v22 = vadd.f32 %v88_v39, %v69_v58  ;;  %v91_v40 = vadd.f32 %v89_v27, %v70_v59  ;;  %v120_v38 = vmul.f32 %v118_v61, %v1478_v12  ;;  %v156_v27 = vperm.slane %v1399_v7, 6 }
  0x18   :  { %642 = vmatpush.msra.mxu1 %v641_v13  ;;  %581 = vmatpush.msra.mxu0 %v1344_v49  ;;  %v1501_v13 = vld [vmem:[%s2280_s1 + $0x68] sm:$0xff]  ;;  %v676_v54 = vsub.f32 %v1387_v1, %v2338_v0  ;;  %v133_v39 = vmul.f32 %v132_v36, %v1492_v45  ;;  %v665_v61 = vand.u32 4294901760, %v1450_v44  ;;  %v2339_v57 = vand.u32 4294901760, %v1392_v6 }
  0x19   :  { %731 = vmatpush.msra.mxu2 %v1359_v55  ;;  %777 = vmatpush.msra.mxu3 %v1344_v49  ;;  %2336 = vst [vmem:[#allocation8_spill] sm:$0xff] %v1501_v13  ;;  %v104_v58 = vadd.f32 %v102_v34, %v90_v22  ;;  %v105_v59 = vadd.f32 %v103_v35, %v91_v40  ;;  %v1550_v22 = vld [vmem:[%s2280_s1 + $0x78] sm:$0xff]  ;;  %v174_v40 = vperm.slane %v1399_v7, 7  ;;  %v671_v44 = vand.u32 4294901760, %v1487_v63  ;;  %v1570_v7 = vld [vmem:[%s2280_s1 + $0x80] sm:$0xff] }
  0x1a   :  { %648 = vmatpush.msra.mxu1 %v647_v31  ;;  %583 = vmatpush.msra.mxu0 %v1346_v50  ;;  %v1524_v31 = vld [vmem:[%s2280_s1 + $0x70] sm:$0xff]  ;;  %v134_v0 = vmul.f32 %v132_v36, %v1501_v13  ;;  %v682_v45 = vsub.f32 %v1392_v6, %v2339_v57  ;;  %2340 = vst [vmem:[#allocation10_spill] sm:$0xff] %v1550_v22  ;;  %v1559_v57 = vld [vmem:[%s2280_s1 + $0x38] sm:$0xff]  ;;  %v677_v13 = vand.u32 4294901760, %v676_v54  ;;  %v2341_v53 = vand.u32 4294901760, %v1432_v41 }
  0x1b   :  { %734 = vmatpush.msra.mxu2 %v1362_v56  ;;  %779 = vmatpush.msra.mxu3 %v1346_v50  ;;  %v143_v35 = vmul.f32 %v142_v24, %v1512_v23  ;;  %v121_v36 = vadd.f32 %v119_v26, %v104_v58  ;;  %v122_v34 = vadd.f32 %v120_v38, %v105_v59 }
  0x1c   :  { %654 = vmatpush.msra.mxu1 %v653_v46  ;;  %585 = vmatpush.msra.mxu0 %v1348_v51  ;;  %v1545_v46 = vld [vmem:[%s2279_s3 + $0x8] sm:$0xff]  ;;  %v144_v12 = vmul.f32 %v142_v24, %v1524_v31  ;;  %v688_v23 = vsub.f32 %v1432_v41, %v2341_v53  ;;  %v157_v63 = vmul.f32 %v156_v27, %v1533_v37  ;;  %v683_v54 = vand.u32 4294901760, %v682_v45 }
  0x1d   :  { %737 = vmatpush.msra.mxu2 %v1380_v62  ;;  %781 = vmatpush.msra.mxu3 %v1348_v51  ;;  %v135_v24 = vadd.f32 %v133_v39, %v121_v36  ;;  %v136_v26 = vadd.f32 %v134_v0, %v122_v34  ;;  %v158_v38 = vmul.f32 %v156_v27, %v1550_v22  ;;  %v188_v53 = vperm.slane %v1545_v46, 0  ;;  %v1589_v39 = vld [vmem:[%s2280_s1 + $0x88] sm:$0xff]  ;;  %v1601_v22 = vld [vmem:[%s2280_s1 + $0x90] sm:$0xff] }
  0x1e   :  { %660 = vmatpush.msra.mxu1 %v659_v60  ;;  %587 = vmatpush.msra.mxu0 %v1351_v52  ;;  %v2342_v60 = vand.u32 4294901760, %v1471_v8  ;;  %v175_v45 = vmul.f32 %v174_v40, %v1559_v57  ;;  %v176_v0 = vmul.f32 %v174_v40, %v1570_v7  ;;  %v223_v36 = vperm.slane %v1545_v46, 1 }
  0x1f   :  { %740 = vmatpush.msra.mxu2 %v1387_v1  ;;  %783 = vmatpush.msra.mxu3 %v1351_v52  ;;  %v145_v27 = vadd.f32 %v143_v35, %v135_v24  ;;  %v146_v59 = vadd.f32 %v144_v12, %v136_v26  ;;  %v689_v34 = vand.u32 4294901760, %v688_v23  ;;  %v1606_v35 = vld [vmem:[%s2280_s1 + $0xd8] sm:$0xff]  ;;  %v233_v12 = vperm.slane %v1545_v46, 2 }
  0x20   :  { %666 = vmatpush.msra.mxu1 %v665_v61  ;;  %589 = vmatpush.msra.mxu0 %v1389_v2  ;;  %v694_v58 = vsub.f32 %v1471_v8, %v2342_v60  ;;  %v1584_v61 = vld [vmem:[%s2280_s1 + $0x40] sm:$0xff]  ;;  %v2343_v60 = vand.u32 4294901760, %v1258_v14  ;;  %v2344_v26 = vand.u32 4294901760, %v1261_v15  ;;  %v224_v15 = vmul.f32 %v1601_v22, %v223_v36 }
  0x21   :  { %743 = vmatpush.msra.mxu2 %v1392_v6  ;;  %785 = vmatpush.msra.mxu3 %v1389_v2  ;;  %v159_v40 = vadd.f32 %v157_v63, %v145_v27  ;;  %v160_v23 = vadd.f32 %v158_v38, %v146_v59  ;;  %v189_v14 = vmul.f32 %v188_v53, %v1584_v61  ;;  %v243_v63 = vperm.slane %v1545_v46, 3  ;;  %v1632_v59 = vld [vmem:[%s2280_s1 + $0xa0] sm:$0xff] }
  0x22   :  { %672 = vmatpush.msra.mxu1 %v671_v44  ;;  %591 = vmatpush.msra.mxu0 %v1403_v21  ;;  %v190_v44 = vmul.f32 %v188_v53, %v1589_v39  ;;  %v695_v24 = vand.u32 4294901760, %v694_v58  ;;  %v225_v58 = vmul.f32 %v1606_v35, %v223_v36  ;;  %v2345_v27 = vand.u32 4294901760, %v1264_v16 }
  0x23   :  { %746 = vmatpush.msra.mxu2 %v1432_v41  ;;  %v177_v38 = vadd.f32 %v175_v45, %v159_v40  ;;  %v178_v53 = vadd.f32 %v176_v0, %v160_v23  ;;  %787 = vmatpush.msra.mxu3 %v1403_v21  ;;  %v2346_v40 = vand.u32 4294901760, %v1270_v18  ;;  %v1648_v23 = vld [vmem:[%s2280_s1 + $0xa8] sm:$0xff] }
  0x24   :  { %798 = vmatpush.msrb.mxu0 %v2343_v60  ;;  %678 = vmatpush.msra.mxu1 %v677_v13  ;;  %v1617_v60 = vld [vmem:[%s2280_s1 + $0x98] sm:$0xff]  ;;  %v1622_v13 = vld [vmem:[%s2280_s1 + $0xe0] sm:$0xff] }
  0x25   :  { %749 = vmatpush.msra.mxu2 %v1471_v8  ;;  %v191_v45 = vadd.f32 %v189_v14, %v177_v38  ;;  %v192_v0 = vadd.f32 %v190_v44, %v178_v53  ;;  %v234_v16 = vmul.f32 %v1617_v60, %v233_v12  ;;  %v235_v36 = vmul.f32 %v1622_v13, %v233_v12  ;;  %v1664_v53 = vld [vmem:[%s2280_s1 + $0xb0] sm:$0xff] }
  0x26   :  { %802 = vmatpush.msrb.mxu0 %v2344_v26  ;;  %684 = vmatpush.msra.mxu1 %v683_v54  ;;  %v1637_v26 = vld [vmem:[%s2280_s1 + $0xe8] sm:$0xff]  ;;  %v253_v54 = vperm.slane %v1545_v46, 4  ;;  %v244_v12 = vmul.f32 %v1632_v59, %v243_v63  ;;  %v2347_v38 = vand.u32 4294901760, %v1273_v19 }
  0x27   :  { %v226_v14 = vadd.f32 %v224_v15, %v191_v45  ;;  %v227_v44 = vadd.f32 %v225_v58, %v192_v0  ;;  %v245_v18 = vmul.f32 %v1637_v26, %v243_v63  ;;  %v273_v15 = vperm.slane %v1545_v46, 6  ;;  %v1675_v63 = vld [vmem:[%s2279_s3 + $0x10] sm:$0xff] }
  0x28   :  { %806 = vmatpush.msrb.mxu0 %v2345_v27  ;;  %690 = vmatpush.msra.mxu1 %v689_v34  ;;  %v1653_v27 = vld [vmem:[%s2280_s1 + $0xf0] sm:$0xff]  ;;  %v263_v34 = vperm.slane %v1545_v46, 5  ;;  %v254_v58 = vmul.f32 %v1648_v23, %v253_v54  ;;  %v2348_v0 = vand.u32 4294901760, %v1285_v25  ;;  %v2351_v25 = vand.u32 4294901760, %v1291_v28 }
  0x29   :  { %v237_v19 = vadd.f32 %v235_v36, %v227_v44  ;;  %v255_v45 = vmul.f32 %v1653_v27, %v253_v54  ;;  %v1701_v44 = vld [vmem:[%s2280_s1 + $0xc0] sm:$0xff] }
  0x2a   :  { %810 = vmatpush.msrb.mxu0 %v2346_v40  ;;  %696 = vmatpush.msra.mxu1 %v695_v24  ;;  %v1669_v24 = vld [vmem:[%s2280_s1 + $0xf8] sm:$0xff]  ;;  %v264_v54 = vmul.f32 %v1664_v53, %v263_v34 }
  0x2b   :  { %v1685_v40 = vld [vmem:[%s2280_s1 + $0xb8] sm:$0xff] }
  0x2c   :  { %865 = vmatpush.msrb.mxu1 %v1229_v3  ;;  %814 = vmatpush.msrb.mxu0 %v2347_v38  ;;  %v236_v3 = vadd.f32 %v234_v16, %v226_v14  ;;  %2349 = vst [vmem:[#allocation11_spill] sm:$0xff] %v1685_v40  ;;  %v1690_v38 = vld [vmem:[%s2280_s1 + $0x100] sm:$0xff]  ;;  %v283_v16 = vperm.slane %v1545_v46, 7  ;;  %v247_v14 = vadd.f32 %v245_v18, %v237_v19  ;;  %v1706_v46 = vld [vmem:[%s2280_s1 + $0x108] sm:$0xff]  ;;  %v2352_v19 = vand.u32 4294901760, %v1308_v33 }
  0x2d   :  { %2350 = vst [vmem:[#allocation12_spill] sm:$0xff] %v1690_v38  ;;  %v274_v18 = vmul.f32 %v1685_v40, %v273_v15  ;;  %v2353_v33 = vand.u32 4294901760, %v1342_v48 }
  0x2e   :  { %867 = vmatpush.msrb.mxu1 %v1231_v4  ;;  %818 = vmatpush.msrb.mxu0 %v2348_v0  ;;  %v246_v36 = vadd.f32 %v244_v12, %v236_v3  ;;  %v265_v4 = vmul.f32 %v1669_v24, %v263_v34  ;;  %v293_v12 = vperm.slane %v1675_v63, 0  ;;  %v1712_v34 = vld [vmem:[%s2280_s1 + $0xc8] sm:$0xff]  ;;  %v257_v28 = vadd.f32 %v255_v45, %v247_v14  ;;  %v1722_v0 = vld [vmem:[%s2280_s1 + $0x110] sm:$0xff]  ;;  %v1738_v14 = vld [vmem:[%s2280_s1 + $0x118] sm:$0xff] }
  0x2f   :  { %v275_v3 = vmul.f32 %v1690_v38, %v273_v15  ;;  %v284_v15 = vmul.f32 %v1701_v44, %v283_v16 }
  0x30   :  { %869 = vmatpush.msrb.mxu1 %v1233_v5  ;;  %822 = vmatpush.msrb.mxu0 %v2351_v25  ;;  %v256_v5 = vadd.f32 %v254_v58, %v246_v36  ;;  %v303_v25 = vperm.slane %v1675_v63, 1  ;;  %v1728_v58 = vld [vmem:[%s2280_s1 + $0xd0] sm:$0xff]  ;;  %v267_v36 = vadd.f32 %v265_v4, %v257_v28  ;;  %v332_v4 = vperm.slane %v1675_v63, 2 }
  0x32   :  { %871 = vmatpush.msrb.mxu1 %v1244_v9  ;;  %826 = vmatpush.msrb.mxu0 %v2352_v19  ;;  %v266_v45 = vadd.f32 %v264_v54, %v256_v5  ;;  %v285_v9 = vmul.f32 %v1706_v46, %v283_v16  ;;  %v294_v19 = vmul.f32 %v1712_v34, %v293_v12  ;;  %v1750_v16 = vld [vmem:[%s2280_s1 + $0x120] sm:$0xff]  ;;  %v1755_v5 = vld [vmem:[%s2280_s1 + $0x168] sm:$0xff] }
  0x33   :  { %v277_v40 = vadd.f32 %v275_v3, %v267_v36  ;;  %v295_v54 = vmul.f32 %v1722_v0, %v293_v12  ;;  %v304_v48 = vmul.f32 %v1728_v58, %v303_v25  ;;  %v1768_v3 = vld [vmem:[%s2280_s1 + $0x170] sm:$0xff]  ;;  %v333_v36 = vmul.f32 %v1750_v16, %v332_v4 }
  0x34   :  { %873 = vmatpush.msrb.mxu1 %v1246_v10  ;;  %830 = vmatpush.msrb.mxu0 %v2353_v33  ;;  %v276_v38 = vadd.f32 %v274_v18, %v266_v45  ;;  %v2354_v10 = vand.u32 4294901760, %v1359_v55  ;;  %v305_v18 = vmul.f32 %v1738_v14, %v303_v25  ;;  %v1763_v55 = vld [vmem:[%s2280_s1 + $0x128] sm:$0xff]  ;;  %v352_v45 = vperm.slane %v1675_v63, 4 }
  0x35   :  { %v287_v28 = vadd.f32 %v285_v9, %v277_v40  ;;  %v2355_v40 = vand.u32 4294901760, %v1362_v56  ;;  %v1784_v9 = vld [vmem:[%s2280_s1 + $0x178] sm:$0xff]  ;;  %v362_v56 = vperm.slane %v1675_v63, 5  ;;  %v2356_v33 = vand.u32 4294901760, %v1380_v62 }
  0x36   :  { %875 = vmatpush.msrb.mxu1 %v1248_v11  ;;  %834 = vmatpush.msrb.mxu0 %v2354_v10  ;;  %v286_v12 = vadd.f32 %v284_v15, %v276_v38  ;;  %v342_v11 = vperm.slane %v1675_v63, 3  ;;  %v334_v15 = vmul.f32 %v1755_v5, %v332_v4  ;;  %v1792_v10 = vld [vmem:[%s2280_s1 + $0x138] sm:$0xff] }
  0x37   :  { %v297_v25 = vadd.f32 %v295_v54, %v287_v28  ;;  %v1808_v28 = vld [vmem:[%s2279_s3 + $0x18] sm:$0xff] }
  0x38   :  { %877 = vmatpush.msrb.mxu1 %v1266_v17  ;;  %838 = vmatpush.msrb.mxu0 %v2355_v40  ;;  %v296_v38 = vadd.f32 %v294_v19, %v286_v12  ;;  %v1776_v17 = vld [vmem:[%s2280_s1 + $0x130] sm:$0xff]  ;;  %v343_v4 = vmul.f32 %v1763_v55, %v342_v11  ;;  %v1800_v12 = vld [vmem:[%s2280_s1 + $0x180] sm:$0xff] }
  0x39   :  { %v307_v54 = vadd.f32 %v305_v18, %v297_v25  ;;  %v353_v62 = vmul.f32 %v1776_v17, %v352_v45  ;;  %v363_v25 = vmul.f32 %v1792_v10, %v362_v56 }
  0x3a   :  { %879 = vmatpush.msrb.mxu1 %v1275_v20  ;;  %842 = vmatpush.msrb.mxu0 %v2356_v33  ;;  %v306_v19 = vadd.f32 %v304_v48, %v296_v38  ;;  %v344_v20 = vmul.f32 %v1768_v3, %v342_v11  ;;  %v2357_v48 = vand.u32 4294901760, %v1387_v1  ;;  %v354_v11 = vmul.f32 %v1784_v9, %v352_v45  ;;  %v1815_v38 = vld [vmem:[%s2280_s1 + $0x140] sm:$0xff]  ;;  %v1820_v1 = vld [vmem:[%s2280_s1 + $0x188] sm:$0xff] }
  0x3b   :  { %v336_v40 = vadd.f32 %v334_v15, %v307_v54  ;;  %v364_v33 = vmul.f32 %v1800_v12, %v362_v56  ;;  %v1831_v54 = vld [vmem:[%s2280_s1 + $0x148] sm:$0xff] }
  0x3c   :  { %881 = vmatpush.msrb.mxu1 %v1304_v32  ;;  %846 = vmatpush.msrb.mxu0 %v2357_v48  ;;  %v335_v18 = vadd.f32 %v333_v36, %v306_v19  ;;  %v372_v32 = vperm.slane %v1675_v63, 6  ;;  %v2358_v36 = vand.u32 4294901760, %v1392_v6  ;;  %v382_v19 = vperm.slane %v1675_v63, 7  ;;  %v1836_v48 = vld [vmem:[%s2280_s1 + $0x190] sm:$0xff] }
  0x3d   :  { %v346_v15 = vadd.f32 %v344_v20, %v336_v40  ;;  %2359 = vst [vmem:[#allocation13_spill] sm:$0xff] %v1836_v48  ;;  %v2360_v6 = vand.u32 4294901760, %v1432_v41  ;;  %v1852_v40 = vld [vmem:[%s2280_s1 + $0x198] sm:$0xff]  ;;  %v2361_v41 = vand.u32 4294901760, %v1471_v8  ;;  %v1875_v8 = vld [vmem:[%s2280_s1 + $0x160] sm:$0xff] }
  0x3e   :  { %883 = vmatpush.msrb.mxu1 %v1339_v47  ;;  %850 = vmatpush.msrb.mxu0 %v2358_v36  ;;  %v345_v45 = vadd.f32 %v343_v4, %v335_v18  ;;  %v392_v47 = vperm.slane %v1808_v28, 0  ;;  %v373_v63 = vmul.f32 %v1815_v38, %v372_v32  ;;  %v374_v20 = vmul.f32 %v1820_v1, %v372_v32  ;;  %v1847_v18 = vld [vmem:[%s2280_s1 + $0x150] sm:$0xff] }
  0x3f   :  { %v356_v4 = vadd.f32 %v354_v11, %v346_v15  ;;  %v383_v32 = vmul.f32 %v1831_v54, %v382_v19  ;;  %v384_v36 = vmul.f32 %v1836_v48, %v382_v19  ;;  %v1868_v15 = vld [vmem:[%s2280_s1 + $0x1a0] sm:$0xff]  ;;  %2364 = vst [vmem:[#allocation16_spill] sm:$0xff] %v1875_v8 }
  0x40   :  { %885 = vmatpush.msrb.mxu1 %v1344_v49  ;;  %854 = vmatpush.msrb.mxu0 %v2360_v6  ;;  %v355_v56 = vadd.f32 %v353_v62, %v345_v45  ;;  %v402_v49 = vperm.slane %v1808_v28, 1  ;;  %v1863_v45 = vld [vmem:[%s2280_s1 + $0x158] sm:$0xff]  ;;  %2363 = vst [vmem:[#allocation15_spill] sm:$0xff] %v1868_v15  ;;  %v393_v19 = vmul.f32 %v1847_v18, %v392_v47 }
  0x41   :  { %v366_v11 = vadd.f32 %v364_v33, %v356_v4  ;;  %2362 = vst [vmem:[#allocation14_spill] sm:$0xff] %v1863_v45  ;;  %v394_v6 = vmul.f32 %v1852_v40, %v392_v47  ;;  %v441_v4 = vperm.slane %v1808_v28, 3 }
  0x42   :  { %887 = vmatpush.msrb.mxu1 %v1346_v50  ;;  %858 = vmatpush.msrb.mxu0 %v2361_v41  ;;  %v365_v62 = vadd.f32 %v363_v25, %v355_v56  ;;  %v412_v50 = vperm.slane %v1808_v28, 2  ;;  %v1882_v56 = vld [vmem:[%s2280_s1 + $0x1a8] sm:$0xff]  ;;  %v403_v48 = vmul.f32 %v1863_v45, %v402_v49 }
  0x43   :  { %v376_v33 = vadd.f32 %v374_v20, %v366_v11  ;;  %2365 = vst [vmem:[#allocation17_spill] sm:$0xff] %v1882_v56  ;;  %v1891_v20 = vld [vmem:[%s2280_s1 + $0x1b0] sm:$0xff] }
  0x44   :  { %889 = vmatpush.msrb.mxu1 %v1348_v51  ;;  %v375_v25 = vadd.f32 %v373_v63, %v365_v62  ;;  %v404_v63 = vmul.f32 %v1868_v15, %v402_v49  ;;  %2366 = vst [vmem:[#allocation18_spill] sm:$0xff] %v1891_v20  ;;  %v413_v47 = vmul.f32 %v1875_v8, %v412_v50  ;;  %v1897_v62 = vld [vmem:[%s2280_s1 + $0x1f8] sm:$0xff]  ;;  %v451_v49 = vperm.slane %v1808_v28, 4 }
  0x45   :  { %v386_v41 = vadd.f32 %v384_v36, %v376_v33  ;;  %2367 = vst [vmem:[#allocation19_spill] sm:$0xff] %v1897_v62  ;;  %v1905_v36 = vld [vmem:[%s2280_s1 + $0x1b8] sm:$0xff]  ;;  %v442_v33 = vmul.f32 %v1891_v20, %v441_v4  ;;  %v471_v20 = vperm.slane %v1808_v28, 6 }
  0x46   :  { %891 = vmatpush.msrb.mxu1 %v1351_v52  ;;  %v385_v51 = vadd.f32 %v383_v32, %v375_v25  ;;  %v414_v32 = vmul.f32 %v1882_v56, %v412_v50  ;;  %2368 = vst [vmem:[#allocation20_spill] sm:$0xff] %v1905_v36  ;;  %v1910_v25 = vld [vmem:[%s2280_s1 + $0x200] sm:$0xff]  ;;  %v443_v50 = vmul.f32 %v1897_v62, %v441_v4  ;;  %v1940_v62 = vld [vmem:[%s2280_s1 + $0x210] sm:$0xff]  ;;  %v481_v56 = vperm.slane %v1808_v28, 7 }
  0x47   :  { %v396_v11 = vadd.f32 %v394_v6, %v386_v41  ;;  %2369 = vst [vmem:[#allocation21_spill] sm:$0xff] %v1910_v25  ;;  %v461_v6 = vperm.slane %v1808_v28, 5  ;;  %v1924_v41 = vld [vmem:[%s2280_s1 + $0x208] sm:$0xff]  ;;  %v1958_v28 = vld [vmem:[%s2280_s1 + $0x1d8] sm:$0xff] }
  0x48   :  { %893 = vmatpush.msrb.mxu1 %v1389_v2  ;;  %v395_v52 = vadd.f32 %v393_v19, %v385_v51  ;;  %v1919_v51 = vld [vmem:[%s2280_s1 + $0x1c0] sm:$0xff]  ;;  %2371 = vst [vmem:[#allocation23_spill] sm:$0xff] %v1924_v41 }
  0x49   :  { %v406_v19 = vadd.f32 %v404_v63, %v396_v11  ;;  %2370 = vst [vmem:[#allocation22_spill] sm:$0xff] %v1919_v51  ;;  %v452_v63 = vmul.f32 %v1905_v36, %v451_v49  ;;  %v1935_v11 = vld [vmem:[%s2280_s1 + $0x1c8] sm:$0xff] }
  0x4a   :  { %895 = vmatpush.msrb.mxu1 %v1403_v21  ;;  %v405_v2 = vadd.f32 %v403_v48, %v395_v52  ;;  %v39_v21 = vld [vmem:[%s2279_s3 + $0x20] sm:$0xf]  ;;  %v453_v52 = vmul.f32 %v1910_v25, %v451_v49  ;;  %2372 = vst [vmem:[#allocation24_spill] sm:$0xff] %v1935_v11  ;;  %v1948_v49 = vld [vmem:[%s2280_s1 + $0x1d0] sm:$0xff] }
  0x4b   :  { %v416_v4 = vadd.f32 %v414_v32, %v406_v19  ;;  %2373 = vst [vmem:[#allocation25_spill] sm:$0xff] %v1940_v62  ;;  %v463_v32 = vmul.f32 %v1924_v41, %v461_v6  ;;  %v491_v19 = vperm.slane %v39_v21, 0  ;;  %v501_v41 = vperm.slane %v39_v21, 1 }
  0x4c   :  { %v415_v48 = vadd.f32 %v413_v47, %v405_v2  ;;  %v462_v47 = vmul.f32 %v1919_v51, %v461_v6  ;;  %v1953_v2 = vld [vmem:[%s2280_s1 + $0x218] sm:$0xff]  ;;  %2375 = vst [vmem:[#allocation27_spill] sm:$0xff] %v1958_v28  ;;  %v472_v6 = vmul.f32 %v1935_v11, %v471_v20  ;;  %v1970_v51 = vld [vmem:[%s2280_s1 + $0x1e0] sm:$0xff]  ;;  %v511_v45 = vperm.slane %v39_v21, 2 }
  0x4d   :  { %v445_v15 = vadd.f32 %v443_v50, %v416_v4  ;;  %2374 = vst [vmem:[#allocation26_spill] sm:$0xff] %v1953_v2  ;;  %v1965_v4 = vld [vmem:[%s2280_s1 + $0x220] sm:$0xff] }
  0x4e   :  { %v444_v8 = vadd.f32 %v442_v33, %v415_v48  ;;  %v473_v48 = vmul.f32 %v1940_v62, %v471_v20  ;;  %2376 = vst [vmem:[#allocation28_spill] sm:$0xff] %v1965_v4  ;;  %v1977_v20 = vld [vmem:[%s2280_s1 + $0x228] sm:$0xff]  ;;  %v493_v11 = vmul.f32 %v1965_v4, %v491_v19 }
  0x4f   :  { %v455_v50 = vadd.f32 %v453_v52, %v445_v15  ;;  %2377 = vst [vmem:[#allocation29_spill] sm:$0xff] %v1970_v51  ;;  %v483_v15 = vmul.f32 %v1953_v2, %v481_v56 }
  0x50   :  { %v454_v33 = vadd.f32 %v452_v63, %v444_v8  ;;  %v482_v8 = vmul.f32 %v1948_v49, %v481_v56  ;;  %2378 = vst [vmem:[#allocation30_spill] sm:$0xff] %v1977_v20  ;;  %v492_v63 = vmul.f32 %v1958_v28, %v491_v19  ;;  %v1989_v56 = vld [vmem:[%s2280_s1 + $0x230] sm:$0xff] }
  0x51   :  { %v465_v36 = vadd.f32 %v463_v32, %v455_v50  ;;  %v502_v32 = vmul.f32 %v1970_v51, %v501_v41  ;;  %v1996_v19 = vld [vmem:[%s2280_s1 + $0x1f0] sm:$0xff] }
  0x52   :  { %v464_v25 = vadd.f32 %v462_v47, %v454_v33  ;;  %v1984_v47 = vld [vmem:[%s2280_s1 + $0x1e8] sm:$0xff]  ;;  %2379 = vst [vmem:[#allocation31_spill] sm:$0xff] %v1996_v19 }
  0x53   :  { %v475_v62 = vadd.f32 %v473_v48, %v465_v36  ;;  %v521_v36 = vperm.slane %v39_v21, 3  ;;  %v512_v28 = vmul.f32 %v1984_v47, %v511_v45 }
  0x54   :  { %v474_v52 = vadd.f32 %v472_v6, %v464_v25  ;;  %v503_v25 = vmul.f32 %v1977_v20, %v501_v41  ;;  %v2001_v6 = vld [vmem:[%s2280_s1 + $0x238] sm:$0xff] }
  0x55   :  { %v485_v50 = vadd.f32 %v483_v15, %v475_v62  ;;  %2380 = vst [vmem:[#allocation32_spill] sm:$0xff] %v2001_v6  ;;  %v522_v41 = vmul.f32 %v1996_v19, %v521_v36  ;;  %v523_v21 = vmul.f32 %v2001_v6, %v521_v36 }
  0x56   :  { %v484_v33 = vadd.f32 %v482_v8, %v474_v52  ;;  %v513_v8 = vmul.f32 %v1989_v56, %v511_v45 }
  0x57   :  { %v495_v4 = vadd.f32 %v493_v11, %v485_v50 }
  0x58   :  { %v494_v48 = vadd.f32 %v492_v63, %v484_v33 }
  0x59   :  { %v505_v15 = vadd.f32 %v503_v25, %v495_v4 }
  0x5a   :  { %v504_v62 = vadd.f32 %v502_v32, %v494_v48 }
  0x5b   :  { %v515_v20 = vadd.f32 %v513_v8, %v505_v15 }
  0x5c   :  { %v514_v52 = vadd.f32 %v512_v28, %v504_v62 }
  0x5d   :  { %v2009_v2 = vadd.f32 %v523_v21, %v515_v20 }
  0x5e   :  { %v2007_v51 = vadd.f32 %v522_v41, %v514_v52 }
  0x5f   :  { %2382 = vst [vmem:[#allocation34_spill] sm:$0xff] %v2009_v2  ;;  %v534_v45 = vmul.f32 %v2009_v2, %v2009_v2 }
  0x60   :  { %2381 = vst [vmem:[#allocation33_spill] sm:$0xff] %v2007_v51  ;;  %v526_v63 = vadd.f32 %v2009_v2, %v2007_v51  ;;  %v533_v11 = vmul.f32 %v2007_v51, %v2007_v51 }
  0x62   :  { %v527_v4 = vrot.slane %v526_v63, 4  ;;  %v535_v32 = vadd.f32 %v534_v45, %v533_v11  ;;  %v901_v45 = vld [vmem:[%s2281_s7] sm:$0xff] }
  0x64   :  { %v528_v33 = vadd.f32 %v527_v4, %v526_v63  ;;  %v536_v50 = vrot.slane %v535_v32, 4  ;;  %v921_v4 = vand.u32 4294901760, %v901_v45 }
  0x66   :  { %v529_v25 = vrot.slane %v528_v33, 2  ;;  %v537_v28 = vadd.f32 %v536_v50, %v535_v32  ;;  %v948_v32 = vsub.f32 %v901_v45, %v921_v4  ;;  %922 = vmatpush.msrb.mxu2 %v921_v4 }
  0x68   :  { %v530_v36 = vadd.f32 %v529_v25, %v528_v33  ;;  %v538_v48 = vrot.slane %v537_v28, 2  ;;  %v949_v33 = vand.u32 4294901760, %v948_v32 }
  0x6a   :  { %v531_v8 = vrot.slane %v530_v36, 1  ;;  %v539_v20 = vadd.f32 %v538_v48, %v537_v28  ;;  %v950_v50 = vsub.f32 %v948_v32, %v949_v33 }
  0x6c   :  { %v532_v62 = vadd.f32 %v531_v8, %v530_v36  ;;  %v540_v15 = vrot.slane %v539_v20, 1  ;;  %v951_v25 = vand.u32 4294901760, %v950_v50 }
  0x6e   :  { %v541_v41 = vadd.f32 %v540_v15, %v539_v20  ;;  %952 = vmatpush.msrb.mxu3 %v951_v25  ;;  %v30_v25 = vld [vmem:[%s2284_s2] sm:$0xff] }
  0x70   :  { %v543_v21 = vsel %vm542_vm0, %v532_v62, %v541_v41 }
  0x71   :  { %v592_v52 = vand.u32 4294901760, %v543_v21 }
  0x73   :  { %v593_v51 = vsub.f32 %v543_v21, %v592_v52  ;;  %698 = vmatmul.f32.vlgmr.msra.gmra.mxu1 %v592_v52 }
  0x75   :  { %752 = vmatmul.f32.vlgmr.msra.gmra.mxu2 %v593_v51  ;;  %v594_v2 = vand.u32 4294901760, %v593_v51 }
  0x76   :  { %975 = vmatpush.msra.mxu2 %v948_v32 }
  0x77   :  { %791 = vmatmul.f32.vlgmr.msra.gmra.mxu3 %v594_v2  ;;  %v595_v11 = vsub.f32 %v593_v51, %v594_v2 }
  0x78   :  { %998 = vmatpush.msra.mxu3 %v921_v4 }
  0x79   :  { %v596_v63 = vand.u32 4294901760, %v595_v11 }
  0x7b   :  { %597 = vmatmul.f32.vlgmr.msra.gmra.mxu0 %v596_v63  ;;  %897 = vmatmul.f32.vlgmr.msrb.gmra.mxu1 %v592_v52 }
  0x83   :  { %860 = vmatmul.f32.vlgmr.msrb.gmra.mxu0 %v592_v52 }
  0xf0   :  { %v699_v28 = vpop.f32.mrf.mxu1 }
  0xf8   :  { %v598_v36 = vpop.f32.mrf.mxu0  ;;  %v753_v51 = vpop.f32.mrf.mxu2 }
  0xf9   :  { %v700_v2 = vadd.f32 %v699_v28, %v598_v36  ;;  %v898_v15 = vpop.f32.mrf.mxu1  ;;  %v63_v28 = vperm.slane %v30_v25, 0  ;;  %v82_v36 = vperm.slane %v30_v25, 1 }
  0xfa   :  { %v792_v8 = vpop.f32.mrf.mxu3 }
  0xfb   :  { %v754_v48 = vadd.f32 %v753_v51, %v700_v2  ;;  %v64_v51 = vmul.f32 %v63_v28, %v1410_v29  ;;  %v65_v2 = vmul.f32 %v63_v28, %v1415_v30  ;;  %v2387_v30 = vld [vmem:[#allocation7_spill] sm:$0xff] }
  0xfd   :  { %v793_v20 = vadd.f32 %v792_v8, %v754_v48  ;;  %v84_v48 = vmul.f32 %v82_v36, %v1444_v43  ;;  %v96_v8 = vperm.slane %v30_v25, 2  ;;  %v137_v43 = vperm.slane %v30_v25, 5 }
 0x100   :  { %v861_v62 = vpop.f32.mrf.mxu0 }
 0x101   :  { %v862_v41 = vadd.f32 %v861_v62, %v793_v20  ;;  %v113_v62 = vperm.slane %v30_v25, 3 }
 0x103   :  { %v899_v21 = vadd.f32 %v898_v15, %v862_v41  ;;  %v2383_v15 = vld [vmem:[#allocation3_spill] sm:$0xff] }
 0x104   :  { %v97_v41 = vmul.f32 %v96_v8, %v2383_v15  ;;  %v151_v15 = vperm.slane %v30_v25, 6 }
 0x105   :  { %v904_v52 = vsel %vm902_vm1, %v899_v21, 0  ;;  %v2384_v21 = vld [vmem:[#allocation5_spill] sm:$0xff] }
 0x106   :  { %v923_v11 = vand.u32 4294901760, %v904_v52 }
 0x108   :  { %v924_v63 = vsub.f32 %v904_v52, %v923_v11  ;;  %954 = vmatmul.f32.vlgmr.msrb.gmra.mxu3 %v923_v11  ;;  %v98_v52 = vmul.f32 %v96_v8, %v2384_v21 }
 0x109   :  { %1046 = vmatpush.msrb.mxu3 %v921_v4  ;;  %v83_v4 = vmul.f32 %v82_v36, %v1439_v42  ;;  %v2388_v42 = vld [vmem:[#allocation8_spill] sm:$0xff] }
 0x10a   :  { %v925_v45 = vand.u32 4294901760, %v924_v63 }
 0x10b   :  { %v85_v20 = vadd.f32 %v83_v4, %v64_v51 }
 0x10c   :  { %v926_v32 = vsub.f32 %v924_v63, %v925_v45 }
 0x10d   :  { %v99_v29 = vadd.f32 %v97_v41, %v85_v20  ;;  %v169_v20 = vperm.slane %v30_v25, 7 }
 0x10e   :  { %v927_v50 = vand.u32 4294901760, %v926_v32 }
 0x110   :  { %928 = vmatmul.f32.vlgmr.msrb.gmra.mxu2 %v927_v50  ;;  %1002 = vmatmul.f32.vlgmr.msra.gmra.mxu3 %v925_v45  ;;  %v2386_v45 = vld [vmem:[#allocation6_spill] sm:$0xff]  ;;  %v127_v50 = vperm.slane %v30_v25, 4 }
 0x111   :  { %1024 = vmatpush.msrb.mxu2 %v949_v33  ;;  %v86_v33 = vadd.f32 %v84_v48, %v65_v2  ;;  %v115_v32 = vmul.f32 %v113_v62, %v2386_v45  ;;  %v2389_v2 = vld [vmem:[#allocation9_spill] sm:$0xff]  ;;  %v139_v48 = vmul.f32 %v137_v43, %v1524_v31 }
 0x112   :  { %v128_v28 = vmul.f32 %v127_v50, %v2387_v30  ;;  %v129_v19 = vmul.f32 %v127_v50, %v2388_v42  ;;  %v138_v4 = vmul.f32 %v137_v43, %v2389_v2 }
 0x113   :  { %v100_v6 = vadd.f32 %v98_v52, %v86_v33  ;;  %v31_v33 = vld [vmem:[%s2284_s2 + $0x8] sm:$0xff] }
 0x114   :  { %v228_v43 = vperm.slane %v31_v33, 2  ;;  %v238_v2 = vperm.slane %v31_v33, 3 }
 0x115   :  { %v117_v51 = vadd.f32 %v115_v32, %v100_v6  ;;  %v170_v6 = vmul.f32 %v169_v20, %v1559_v57  ;;  %v183_v32 = vperm.slane %v31_v33, 0 }
 0x116   :  { %v229_v57 = vmul.f32 %v1617_v60, %v228_v43 }
 0x117   :  { %v131_v21 = vadd.f32 %v129_v19, %v117_v51  ;;  %v184_v19 = vmul.f32 %v183_v32, %v1584_v61  ;;  %v239_v61 = vmul.f32 %v1632_v59, %v238_v2  ;;  %v2391_v59 = vld [vmem:[#allocation11_spill] sm:$0xff] }
 0x118   :  { %978 = vmatmul.f32.vlgmr.msra.gmra.mxu2 %v924_v63  ;;  %1048 = vmatmul.f32.vlgmr.msrb.gmra.mxu3 %v923_v11 }
 0x119   :  { %v141_v52 = vadd.f32 %v139_v48, %v131_v21 }
 0x120   :  { %1026 = vmatmul.f32.vlgmr.msrb.gmra.mxu2 %v923_v11  ;;  %v2385_v11 = vld [vmem:[#allocation4_spill] sm:$0xff] }
 0x121   :  { %v114_v63 = vmul.f32 %v113_v62, %v2385_v11  ;;  %v152_v11 = vmul.f32 %v151_v15, %v1533_v37  ;;  %v2390_v62 = vld [vmem:[#allocation10_spill] sm:$0xff]  ;;  %v185_v37 = vmul.f32 %v183_v32, %v1589_v39  ;;  %v240_v39 = vmul.f32 %v1637_v26, %v238_v2  ;;  %v2392_v26 = vld [vmem:[#allocation12_spill] sm:$0xff] }
 0x122   :  { %v153_v45 = vmul.f32 %v151_v15, %v2390_v62  ;;  %v248_v15 = vperm.slane %v31_v33, 4  ;;  %v278_v32 = vperm.slane %v31_v33, 7 }
 0x123   :  { %v116_v36 = vadd.f32 %v114_v63, %v99_v29  ;;  %v171_v63 = vmul.f32 %v169_v20, %v1570_v7  ;;  %v218_v29 = vperm.slane %v31_v33, 1  ;;  %v230_v7 = vmul.f32 %v1622_v13, %v228_v43 }
 0x124   :  { %v155_v50 = vadd.f32 %v153_v45, %v141_v52  ;;  %v268_v20 = vperm.slane %v31_v33, 6 }
 0x125   :  { %v130_v8 = vadd.f32 %v128_v28, %v116_v36  ;;  %v219_v28 = vmul.f32 %v1601_v22, %v218_v29  ;;  %v220_v42 = vmul.f32 %v1606_v35, %v218_v29  ;;  %v249_v22 = vmul.f32 %v1648_v23, %v248_v15  ;;  %v32_v23 = vld [vmem:[%s2284_s2 + $0x10] sm:$0xff] }
 0x126   :  { %v173_v25 = vadd.f32 %v171_v63, %v155_v50  ;;  %v250_v35 = vmul.f32 %v1653_v27, %v248_v15  ;;  %v270_v63 = vmul.f32 %v2392_v26, %v268_v20  ;;  %v279_v50 = vmul.f32 %v1701_v44, %v278_v32 }
 0x127   :  { %v140_v41 = vadd.f32 %v138_v4, %v130_v8  ;;  %v298_v29 = vperm.slane %v32_v23, 1  ;;  %v367_v15 = vperm.slane %v32_v23, 6 }
 0x128   :  { %v187_v51 = vadd.f32 %v185_v37, %v173_v25  ;;  %v288_v37 = vperm.slane %v32_v23, 0 }
 0x129   :  { %v154_v31 = vadd.f32 %v152_v11, %v140_v41  ;;  %v258_v11 = vperm.slane %v31_v33, 5  ;;  %v299_v43 = vmul.f32 %v1728_v58, %v298_v29 }
 0x12a   :  { %v222_v48 = vadd.f32 %v220_v42, %v187_v51  ;;  %v290_v33 = vmul.f32 %v1722_v0, %v288_v37  ;;  %v327_v42 = vperm.slane %v32_v23, 2 }
 0x12b   :  { %v172_v30 = vadd.f32 %v170_v6, %v154_v31  ;;  %v259_v60 = vmul.f32 %v1664_v53, %v258_v11  ;;  %v260_v13 = vmul.f32 %v1669_v24, %v258_v11  ;;  %v269_v6 = vmul.f32 %v2391_v59, %v268_v20 }
 0x12c   :  { %v232_v21 = vadd.f32 %v230_v7, %v222_v48  ;;  %v280_v24 = vmul.f32 %v1706_v46, %v278_v32  ;;  %v328_v44 = vmul.f32 %v1750_v16, %v327_v42  ;;  %v329_v7 = vmul.f32 %v1755_v5, %v327_v42  ;;  %v2074_v16 = vld [vmem:[%s2284_s2 + $0x18] sm:$0xff] }
 0x12d   :  { %v186_v36 = vadd.f32 %v184_v19, %v172_v30  ;;  %v347_v48 = vperm.slane %v32_v23, 4  ;;  %v397_v26 = vperm.slane %v2074_v16, 1 }
 0x12e   :  { %v242_v45 = vadd.f32 %v240_v39, %v232_v21 }
 0x12f   :  { %v221_v4 = vadd.f32 %v219_v28, %v186_v36  ;;  %v289_v28 = vmul.f32 %v1712_v34, %v288_v37  ;;  %v300_v36 = vmul.f32 %v1738_v14, %v298_v29  ;;  %v348_v14 = vmul.f32 %v1776_v17, %v347_v48 }
 0x130   :  { %v252_v52 = vadd.f32 %v250_v35, %v242_v45  ;;  %v369_v17 = vmul.f32 %v1820_v1, %v367_v15  ;;  %v40_v45 = vlaneseq }
 0x131   :  { %v231_v8 = vadd.f32 %v229_v57, %v221_v4  ;;  %v337_v4 = vperm.slane %v32_v23, 3 }
 0x132   :  { %v262_v31 = vadd.f32 %v260_v13, %v252_v52  ;;  %v41_v1 = vshrl.u32 %v40_v45, 7  ;;  %v2086_v32 = vand.u32 127, %v40_v45 }
 0x133   :  { %v241_v62 = vadd.f32 %v239_v61, %v231_v8  ;;  %v357_v61 = vperm.slane %v32_v23, 5  ;;  %v338_v0 = vmul.f32 %v1763_v55, %v337_v4  ;;  %v339_v58 = vmul.f32 %v1768_v3, %v337_v4 }
 0x134   :  { %v272_v53 = vadd.f32 %v270_v63, %v262_v31  ;;  %v349_v8 = vmul.f32 %v1784_v9, %v347_v48  ;;  %v368_v55 = vmul.f32 %v1815_v38, %v367_v15  ;;  %v387_v9 = vperm.slane %v2074_v16, 0  ;;  %v2400_v48 = vld [vmem:[#allocation18_spill] sm:$0xff] }
 0x135   :  { %v251_v41 = vadd.f32 %v249_v22, %v241_v62  ;;  %v358_v21 = vmul.f32 %v1792_v10, %v357_v61  ;;  %v359_v35 = vmul.f32 %v1800_v12, %v357_v61  ;;  %v377_v62 = vperm.slane %v32_v23, 7 }
 0x136   :  { %v282_v25 = vadd.f32 %v280_v24, %v272_v53  ;;  %v388_v12 = vmul.f32 %v1847_v18, %v387_v9  ;;  %v389_v38 = vmul.f32 %v1852_v40, %v387_v9  ;;  %v2395_v24 = vld [vmem:[#allocation15_spill] sm:$0xff]  ;;  %vm73_vm2 = vcmp.ge.s32.totalorder %v41_v1, 1  ;;  %v2405_v9 = vld [vmem:[#allocation21_spill] sm:$0xff] }
 0x137   :  { %v261_v27 = vadd.f32 %v259_v60, %v251_v41  ;;  %v378_v13 = vmul.f32 %v1831_v54, %v377_v62  ;;  %v2393_v41 = vld [vmem:[#allocation13_spill] sm:$0xff]  ;;  %v407_v54 = vperm.slane %v2074_v16, 2  ;;  %v399_v37 = vmul.f32 %v2395_v24, %v397_v26 }
 0x138   :  { %v292_v57 = vadd.f32 %v290_v33, %v282_v25  ;;  %v379_v52 = vmul.f32 %v2393_v41, %v377_v62  ;;  %vm75_vm3 = vcmp.ge.s32.totalorder %v2086_v32, 8  ;;  %v436_v18 = vperm.slane %v2074_v16, 3  ;;  %v2398_v25 = vld [vmem:[#allocation16_spill] sm:$0xff]  ;;  %v2399_v33 = vld [vmem:[#allocation17_spill] sm:$0xff] }
 0x139   :  { %v271_v19 = vadd.f32 %v269_v6, %v261_v27  ;;  %vm2096_vm4 = vmand %vm73_vm2, %vm75_vm3  ;;  %v409_v42 = vmul.f32 %v2399_v33, %v407_v54  ;;  %vm106_vm5 = vcmp.lt.s32.totalorder %v2086_v32, 120  ;;  %v42_v24 = vadd.s32 8, %v41_v1 }
 0x13a   :  { %v302_v2 = vadd.f32 %v300_v36, %v292_v57  ;;  %v1157_v57 = vld [vmem:[%s2280_s1] sm:$0xff]  ;;  %v437_v61 = vmul.f32 %v2400_v48, %v436_v18  ;;  %vm2140_vm6 = vmand %vm73_vm2, %vm106_vm5  ;;  %v1167_v48 = vld [vmem:[%s2280_s1 + $0x28] sm:$0xff] }
 0x13b   :  { %v281_v30 = vadd.f32 %v279_v50, %v271_v19  ;;  %v2394_v19 = vld [vmem:[#allocation14_spill] sm:$0xff]  ;;  %vm162_vm7 = vcmp.le.s32.totalorder %v42_v24, 14 }
 0x13c   :  { %v331_v34 = vadd.f32 %v329_v7, %v302_v2  ;;  %v398_v53 = vmul.f32 %v2394_v19, %v397_v26  ;;  %v2119_v2 = vld [vmem:[%s2280_s1 + $0x68] sm:$0xff]  ;;  %vm2205_vm8 = vmand %vm162_vm7, %vm75_vm3 }
 0x13d   :  { %v291_v51 = vadd.f32 %v289_v28, %v281_v30  ;;  %v408_v28 = vmul.f32 %v2398_v25, %v407_v54  ;;  %v1166_v25 = vld [vmem:[%s2280_s1 + $0x60] sm:$0xff]  ;;  %vm2234_vm9 = vmand %vm162_vm7, %vm106_vm5 }
 0x13e   :  { %v341_v22 = vadd.f32 %v339_v58, %v331_v34  ;;  %v2401_v58 = vld [vmem:[#allocation19_spill] sm:$0xff]  ;;  %v124_v1 = vsel %vm75_vm3, %v1166_v25, %v2119_v2  ;;  %v1174_v25 = vld [vmem:[%s2280_s1 + $0x88] sm:$0xff] }
 0x13f   :  { %v301_v46 = vadd.f32 %v299_v43, %v291_v51 }
 0x140   :  { %v351_v3 = vadd.f32 %v349_v8, %v341_v22 }
 0x141   :  { %v330_v39 = vadd.f32 %v328_v44, %v301_v46  ;;  %v2108_v44 = vld [vmem:[%s2280_s1 + $0x20] sm:$0xff]  ;;  %v1159_v46 = vld [vmem:[%s2280_s1 + $0x48] sm:$0xff] }
 0x142   :  { %v361_v20 = vadd.f32 %v359_v35, %v351_v3  ;;  %v78_v7 = vsel %vm2096_vm4, %v1157_v57, %v2108_v44  ;;  %v79_v4 = vsel %vm75_vm3, %v1159_v46, %v2119_v2  ;;  %v2402_v35 = vld [vmem:[#allocation20_spill] sm:$0xff]  ;;  %v2409_v57 = vld [vmem:[#allocation25_spill] sm:$0xff] }
 0x143   :  { %v340_v5 = vadd.f32 %v338_v0, %v330_v39  ;;  %v446_v39 = vperm.slane %v2074_v16, 4  ;;  %v81_v8 = vmax.f32 %v2119_v2, %v79_v4 }
 0x144   :  { %v371_v6 = vadd.f32 %v369_v17, %v361_v20  ;;  %v1162_v20 = vld [vmem:[%s2280_s1 + $0x50] sm:$0xff] }
 0x145   :  { %v350_v11 = vadd.f32 %v348_v14, %v340_v5  ;;  %v438_v14 = vmul.f32 %v2401_v58, %v436_v18  ;;  %v80_v5 = vmax.f32 %v2108_v44, %v78_v7  ;;  %v448_v45 = vmul.f32 %v2405_v9, %v446_v39  ;;  %v1165_v18 = vld [vmem:[%s2280_s1 + $0x18] sm:$0xff] }
 0x146   :  { %v381_v27 = vadd.f32 %v379_v52, %v371_v6  ;;  %v95_v41 = vmax.f32 %v81_v8, %v1162_v20  ;;  %v1163_v52 = vld [vmem:[%s2280_s1 + $0x58] sm:$0xff]  ;;  %v123_v40 = vsel %vm75_vm3, %v1165_v18, %v2108_v44 }
 0x147   :  { %v360_v60 = vadd.f32 %v358_v21, %v350_v11  ;;  %v1161_v21 = vld [vmem:[%s2280_s1 + $0x8] sm:$0xff]  ;;  %v447_v11 = vmul.f32 %v2402_v35, %v446_v39 }
 0x148   :  { %v391_v50 = vadd.f32 %v389_v38, %v381_v27  ;;  %v92_v22 = vsel %vm73_vm2, %v1161_v21, %v2108_v44  ;;  %v1164_v38 = vld [vmem:[%s2280_s1 + $0x10] sm:$0xff]  ;;  %v466_v27 = vperm.slane %v2074_v16, 6  ;;  %v2412_v21 = vld [vmem:[#allocation26_spill] sm:$0xff] }
 0x149   :  { %v370_v59 = vadd.f32 %v368_v55, %v360_v60  ;;  %v456_v55 = vperm.slane %v2074_v16, 5  ;;  %v109_v26 = vsel %vm2140_vm6, %v1164_v38, %v2108_v44 }
 0x14a   :  { %v401_v30 = vadd.f32 %v399_v37, %v391_v50  ;;  %v2407_v50 = vld [vmem:[#allocation23_spill] sm:$0xff]  ;;  %v468_v7 = vmul.f32 %v2409_v57, %v466_v27 }
 0x14b   :  { %v380_v23 = vadd.f32 %v378_v13, %v370_v59  ;;  %v458_v19 = vmul.f32 %v2407_v50, %v456_v55  ;;  %v2418_v50 = vld [vmem:[#allocation30_spill] sm:$0xff] }
 0x14c   :  { %v411_v15 = vadd.f32 %v409_v42, %v401_v30  ;;  %v476_v42 = vperm.slane %v2074_v16, 7  ;;  %v147_v16 = vsel %vm106_vm5, %v1167_v48, %v2108_v44 }
 0x14d   :  { %v390_v31 = vadd.f32 %v388_v12, %v380_v23  ;;  %v94_v12 = vmax.f32 %v80_v5, %v92_v22 }
 0x14e   :  { %v440_v17 = vadd.f32 %v438_v14, %v411_v15  ;;  %v477_v15 = vmul.f32 %v1948_v49, %v476_v42  ;;  %v478_v22 = vmul.f32 %v2412_v21, %v476_v42  ;;  %v1169_v49 = vld [vmem:[%s2280_s1 + $0x30] sm:$0xff] }
 0x14f   :  { %v400_v29 = vadd.f32 %v398_v53, %v390_v31  ;;  %v111_v30 = vmax.f32 %v94_v12, %v109_v26  ;;  %v165_v62 = vsel %vm75_vm3, %v1169_v49, %v2108_v44  ;;  %v2421_v21 = vld [vmem:[#allocation33_spill] sm:$0xff] }
 0x150   :  { %v450_v31 = vadd.f32 %v448_v45, %v440_v17 }
 0x151   :  { %v410_v0 = vadd.f32 %v408_v28, %v400_v29  ;;  %v2408_v28 = vld [vmem:[#allocation24_spill] sm:$0xff]  ;;  %v125_v39 = vmax.f32 %v111_v30, %v123_v40  ;;  %v1172_v40 = vld [vmem:[%s2280_s1 + $0x40] sm:$0xff] }
 0x152   :  { %v467_v33 = vmul.f32 %v2408_v28, %v466_v27  ;;  %v195_v24 = vsel %vm106_vm5, %v1172_v40, %v2108_v44 }
 0x153   :  { %v439_v3 = vadd.f32 %v437_v61, %v410_v0 }
 0x155   :  { %v449_v54 = vadd.f32 %v447_v11, %v439_v3  ;;  %v1170_v3 = vld [vmem:[%s2280_s1 + $0x78] sm:$0xff] }
 0x156   :  { %v166_v17 = vsel %vm2205_vm8, %v1170_v3, %v2119_v2 }
 0x18b   :  { %v955_v10 = vpop.f32.mrf.mxu3 }
 0x193   :  { %v929_v63 = vpop.f32.mrf.mxu2  ;;  %v1003_v43 = vpop.f32.mrf.mxu3 }
 0x194   :  { %v956_v51 = vadd.f32 %v955_v10, %v929_v63  ;;  %v110_v10 = vsel %vm106_vm5, %v1163_v52, %v2119_v2  ;;  %v2406_v63 = vld [vmem:[#allocation22_spill] sm:$0xff] }
 0x195   :  { %v457_v23 = vmul.f32 %v2406_v63, %v456_v55  ;;  %v112_v37 = vmax.f32 %v95_v41, %v110_v10  ;;  %v149_v55 = vmax.f32 %v125_v39, %v147_v16  ;;  %v2414_v41 = vld [vmem:[#allocation28_spill] sm:$0xff] }
 0x196   :  { %v2420_v39 = vld [vmem:[#allocation32_spill] sm:$0xff] }
 0x197   :  { %v126_v4 = vmax.f32 %v112_v37, %v124_v1  ;;  %v196_v1 = vsel %vm2234_vm9, %v1174_v25, %v2119_v2 }
 0x19b   :  { %v979_v36 = vpop.f32.mrf.mxu2  ;;  %v1049_v6 = vpop.f32.mrf.mxu3 }
 0x19c   :  { %v980_v34 = vadd.f32 %v979_v36, %v956_v51  ;;  %v459_v36 = vadd.f32 %v457_v23, %v449_v54  ;;  %v460_v51 = vadd.f32 %v458_v19, %v450_v31  ;;  %v2417_v54 = vld [vmem:[#allocation29_spill] sm:$0xff] }
 0x19e   :  { %v1004_v60 = vadd.f32 %v1003_v43, %v980_v34  ;;  %v2184_v43 = vld [vmem:[%s2284_s2 + $0x20] sm:$0xf]  ;;  %v1168_v34 = vld [vmem:[%s2280_s1 + $0x70] sm:$0xff]  ;;  %v469_v8 = vadd.f32 %v467_v33, %v459_v36  ;;  %v470_v5 = vadd.f32 %v468_v7, %v460_v51 }
 0x19f   :  { %v148_v0 = vsel %vm106_vm5, %v1168_v34, %v2119_v2  ;;  %v486_v58 = vperm.slane %v2184_v43, 0  ;;  %v496_v9 = vperm.slane %v2184_v43, 1  ;;  %v506_v38 = vperm.slane %v2184_v43, 2 }
 0x1a0   :  { %v150_v11 = vmax.f32 %v126_v4, %v148_v0  ;;  %v479_v45 = vadd.f32 %v477_v15, %v469_v8  ;;  %v516_v28 = vperm.slane %v2184_v43, 3  ;;  %v1153_v43 = vld [vmem:[%s2282_s4] ss:$0 sm:$0xff] }
 0x1a1   :  { %v488_v52 = vmul.f32 %v2414_v41, %v486_v58  ;;  %v497_v31 = vmul.f32 %v2417_v54, %v496_v9  ;;  %v498_v19 = vmul.f32 %v2418_v50, %v496_v9  ;;  %v507_v32 = vmul.f32 %v1984_v47, %v506_v38 }
 0x1a2   :  { %v168_v10 = vmax.f32 %v150_v11, %v166_v17  ;;  %v508_v44 = vmul.f32 %v1989_v56, %v506_v38  ;;  %v1086_v47 = vstv %s2285_s0  ;;  %v2422_v11 = vld [vmem:[#allocation34_spill] sm:$0xff] }
 0x1a3   :  { %v1027_v13 = vpop.f32.mrf.mxu2 }
 0x1a4   :  { %v1028_v59 = vadd.f32 %v1027_v13, %v1004_v60  ;;  %v480_v60 = vadd.f32 %v478_v22, %v470_v5  ;;  %v2413_v13 = vld [vmem:[#allocation27_spill] sm:$0xff] }
 0x1a5   :  { %v487_v20 = vmul.f32 %v2413_v13, %v486_v58 }
 0x1a6   :  { %v2163_v53 = vadd.f32 %v1049_v6, %v1028_v59  ;;  %v167_v59 = vmax.f32 %v149_v55, %v165_v62  ;;  %v1171_v6 = vld [vmem:[%s2280_s1 + $0x80] sm:$0xff]  ;;  %v490_v27 = vadd.f32 %v488_v52, %v480_v60 }
 0x1a7   :  { %v180_v12 = vsel %vm162_vm7, %v1171_v6, %v2119_v2  ;;  %v489_v23 = vadd.f32 %v487_v20, %v479_v45  ;;  %v518_v2 = vmul.f32 %v2420_v39, %v516_v28  ;;  %v1154_v62 = vld [vmem:[%s2283_s5] ss:$0 sm:$0xff] }
 0x1a8   :  { %v1052_v29 = vmul.f32 %v2163_v53, %v2163_v53  ;;  %v182_v18 = vmax.f32 %v168_v10, %v180_v12  ;;  %v500_v36 = vadd.f32 %v498_v19, %v490_v27  ;;  %v1068_v34 = vperm.slane %v2163_v53, 0 }
 0x1a9   :  { %v499_v42 = vadd.f32 %v497_v31, %v489_v23 }
 0x1aa   :  { %v1054_v46 = vrot.slane %v1052_v29, 7  ;;  %v1173_v29 = vld [vmem:[%s2280_s1 + $0x38] sm:$0xff]  ;;  %v198_v57 = vmax.f32 %v182_v18, %v196_v1  ;;  %v1069_v22 = vsub.f32 %v2421_v21, %v1068_v34  ;;  %v1070_v55 = vsub.f32 %v2422_v11, %v1068_v34 }
 0x1ab   :  { %v181_v30 = vmax.f32 %v167_v59, %v1173_v29  ;;  %v509_v16 = vadd.f32 %v507_v32, %v499_v42 }
 0x1ac   :  { %v1056_v61 = vsub.f32 %v2163_v53, %v1054_v46  ;;  %v2419_v46 = vld [vmem:[#allocation31_spill] sm:$0xff]  ;;  %v1088_v5 = vmul.f32 %v1086_v47, %v198_v57 }
 0x1ad   :  { %v197_v7 = vmax.f32 %v181_v30, %v195_v24  ;;  %v517_v4 = vmul.f32 %v2419_v46, %v516_v28 }
 0x1ae   :  { %v1057_v35 = vadd.f32 1e-05, %v1056_v61  ;;  %v510_v61 = vadd.f32 %v508_v44, %v500_v36 }
 0x1af   :  { %v1087_v15 = vmul.f32 %v1086_v47, %v197_v7  ;;  %v519_v58 = vadd.f32 %v517_v4, %v509_v16 }
 0x1b0   :  { %1155 = vrsqrt.f32 %v1057_v35  ;;  %vm1064_vm11 = vweird.f32 %v1057_v35  ;;  %v520_v14 = vadd.f32 %v518_v2, %v510_v61 }
 0x1b1   :  { %v1089_v17 = vadd.f32 %v1087_v15, %v519_v58 }
 0x1b2   :  { %v1090_v9 = vadd.f32 %v1088_v5, %v520_v14 }
 0x1b6   :  { %v1156_v26 = vpop.eup %1155 }
 0x1b7   :  { %v1059_v37 = vmul.f32 %v1156_v26, %v1057_v35  ;;  %vm1065_vm10 = vweird.f32 %v1156_v26 }
 0x1b8   :  { %vm1066_vm12 = vmor %vm1064_vm11, %vm1065_vm10 }
 0x1b9   :  { %v1060_v33 = vmul.f32 %v1156_v26, %v1059_v37 }
 0x1bb   :  { %v1061_v51 = vmul.f32 0.5, %v1060_v33 }
 0x1bd   :  { %v1062_v48 = vsub.f32 1.5, %v1061_v51 }
 0x1bf   :  { %v1063_v56 = vmul.f32 %v1156_v26, %v1062_v48 }
 0x1c1   :  { %v1067_v0 = vsel %vm1066_vm12, %v1156_v26, %v1063_v56 }
 0x1c2   :  { %v1075_v8 = vmul.f32 %v1153_v43, %v1067_v0 }
 0x1c4   :  { %v1076_v49 = vperm.slane %v1075_v8, 1 }
 0x1c6   :  { %v1077_v3 = vmul.f32 %v1076_v49, %v1069_v22  ;;  %v1078_v35 = vmul.f32 %v1076_v49, %v1070_v55 }
 0x1c8   :  { %v1083_v53 = vadd.f32 %v1154_v62, %v1077_v3  ;;  %v1084_v45 = vadd.f32 %v1154_v62, %v1078_v35 }
 0x1ca   :  { %v1091_v60 = vadd.f32 %v1089_v17, %v1083_v53  ;;  %v1092_v13 = vadd.f32 %v1090_v9, %v1084_v45 }
 0x1cc   :  { %1093 = vst [vmem:[%s2286_s8] sm:$0xff] %v1091_v60 }
 0x1cd   :  { %1094 = vst [vmem:[%s2286_s8 + $0x8] sm:$0xff] %v1092_v13 }

</bundles_post_ra>
